<compile_context>
chip_gen: v7x
topology: tpu7x:2x2x1
jax: 0.10.0
libtpu: 0.0.40
codegen_flags: <defaults>
</compile_context>

<pallas_src>
import math

import jax
import jax.numpy as jnp
from jax.experimental import pallas as pl
from jax.experimental.pallas import tpu as pltpu


def _round_up(x, m):
    return ((x + m - 1) // m) * m


# -----------------------------------------------------------------------------
# Kernel 1: bottleneck   u = relu(bn2(conv1x1(relu(bn1(x)))))
#   x      : (1, H, W, CPAD)   running feature buffer (f32, lane-dense)
#   s1, t1 : (1, CPAD)         folded BN1 scale/shift (zero on padded channels)
#   w1     : (CPAD, CMIDP)     channel-padded 1x1-conv weight (compute dtype)
#   s2, t2 : (1, CMIDP)        folded BN2 scale/shift
#   u      : (1, H, W, CMIDP)  bottleneck activation (f32)
# -----------------------------------------------------------------------------
def _bottleneck_kernel(x_ref, s1_ref, t1_ref, w1_ref, s2_ref, t2_ref, u_ref):
    _, h, w, cp = x_ref.shape
    hw = h * w
    x = x_ref[...].reshape(hw, cp)                                  # lane-dense load
    xn = jnp.maximum(x * s1_ref[...] + t1_ref[...], 0.0)           # BN1 + ReLU (f32 VPU)
    t = jnp.dot(xn.astype(w1_ref.dtype), w1_ref[...],
                preferred_element_type=jnp.float32)                 # 1x1 conv on the MXU
    u = jnp.maximum(t * s2_ref[...] + t2_ref[...], 0.0)            # BN2 + ReLU (f32)
    u_ref[...] = u.reshape(u_ref.shape).astype(u_ref.dtype)


# -----------------------------------------------------------------------------
# Kernel 2: 3x3 conv (padding=1, no bias) + in-place "concat".
# The nine taps are gathered on-chip from the spatially padded bottleneck (no
# HBM im2col); the layer's output channels are already placed at their final
# lane offset by the zero-padded weight, so the new features are simply added
# onto the aliased running feature buffer (its target lanes are still zero).
# -----------------------------------------------------------------------------
def _conv3x3_concat_kernel(upad_ref, w2_ref, f_ref, o_ref):
    _, hp2, wp2, cm = upad_ref.shape
    h, w = hp2 - 2, wp2 - 2
    cp = o_ref.shape[3]
    acc = jnp.zeros((h * w, cp), jnp.float32)
    for tap in range(9):                                   # unrolled: 9 MXU matmuls
        kh, kw = tap // 3, tap % 3
        patch = upad_ref[0, kh:kh + h, kw:kw + w, :].reshape(h * w, cm)
        acc = acc + jnp.dot(patch.astype(w2_ref.dtype), w2_ref[tap],
                            preferred_element_type=jnp.float32)
    o_ref[...] = f_ref[...] + acc.reshape(o_ref.shape).astype(o_ref.dtype)


# -----------------------------------------------------------------------------
# Kernel 3: ECA — global average pool, 1D channel conv (expressed as a small
# banded matmul built in the wrapper), sigmoid, channel-wise rescale.
# One single pass over the feature buffer.
# -----------------------------------------------------------------------------
def _eca_kernel(y_ref, band_ref, o_ref):
    _, h, w, cp = y_ref.shape
    hw = h * w
    y = y_ref[...].reshape(hw, cp)
    pooled = jnp.mean(y, axis=0, keepdims=True)                     # (1, CPAD)
    z = jnp.dot(pooled, band_ref[...], preferred_element_type=jnp.float32)
    attn = 1.0 / (1.0 + jnp.exp(-z))                                # sigmoid (EUP)
    o_ref[...] = (y * attn).reshape(o_ref.shape).astype(o_ref.dtype)


def _fold_bn(gamma, beta, mean, var, eps, width):
    """Eval-mode BatchNorm folded to per-channel scale/shift, zero-padded to `width`."""
    scale = gamma / jnp.sqrt(var + eps)
    shift = beta - mean * scale
    s = jnp.zeros((1, width), jnp.float32).at[0, : scale.shape[0]].set(scale)
    t = jnp.zeros((1, width), jnp.float32).at[0, : shift.shape[0]].set(shift)
    return s, t


def dense_block_eca_forward(x_nchw, layer_params, eca_weight, *,
                            compute_dtype=jnp.bfloat16, eps=1e-5):
    """Forward pass of _DenseBlock_eca (eval-mode BN), NCHW in / NCHW out."""
    n, c0, h, w = x_nchw.shape
    num_layers = len(layer_params)
    growth = layer_params[0]["w2"].shape[0]
    cmid = layer_params[0]["w2"].shape[1]
    c_total = c0 + num_layers * growth
    cpad = _round_up(c_total, 128)       # lane-dense channel padding
    cmidp = _round_up(cmid, 128)

    # Single entry layout change: NCHW -> channel-padded channels-last buffer.
    feats = jnp.zeros((n, h, w, cpad), jnp.float32)
    feats = feats.at[..., :c0].set(jnp.transpose(x_nchw, (0, 2, 3, 1)))

    parallel = pltpu.CompilerParams(dimension_semantics=("parallel",))

    for i, p in enumerate(layer_params):
        cin = c0 + i * growth            # valid input channels == output lane offset
        s1, t1 = _fold_bn(p["g1"], p["b1"], p["m1"], p["v1"], eps, cpad)
        s2, t2 = _fold_bn(p["g2"], p["b2"], p["m2"], p["v2"], eps, cmidp)

        w1p = jnp.zeros((cpad, cmidp), compute_dtype)
        w1p = w1p.at[:cin, :cmid].set(p["w1"][:, :, 0, 0].T.astype(compute_dtype))

        # (g, Cmid, 3, 3) -> (9, Cmid, g), placed at the layer's channel offset.
        w2r = jnp.transpose(p["w2"], (2, 3, 1, 0)).reshape(9, cmid, growth)
        w2p = jnp.zeros((9, cmidp, cpad), compute_dtype)
        w2p = w2p.at[:, :cmid, cin:cin + growth].set(w2r.astype(compute_dtype))

        # --- bottleneck: BN1 -> ReLU -> 1x1 conv -> BN2 -> ReLU (one fused kernel)
        u = pl.pallas_call(
            _bottleneck_kernel,
            out_shape=jax.ShapeDtypeStruct((n, h, w, cmidp), jnp.float32),
            grid=(n,),
            in_specs=[
                pl.BlockSpec((1, h, w, cpad), lambda b: (b, 0, 0, 0)),
                pl.BlockSpec((1, cpad), lambda b: (0, 0)),
                pl.BlockSpec((1, cpad), lambda b: (0, 0)),
                pl.BlockSpec((cpad, cmidp), lambda b: (0, 0)),
                pl.BlockSpec((1, cmidp), lambda b: (0, 0)),
                pl.BlockSpec((1, cmidp), lambda b: (0, 0)),
            ],
            out_specs=pl.BlockSpec((1, h, w, cmidp), lambda b: (b, 0, 0, 0)),
            compiler_params=parallel,
        )(feats, s1, t1, w1p, s2, t2)

        # Cheap single-pass spatial halo pad of the (small) bottleneck tensor.
        u_pad = jnp.pad(u, ((0, 0), (1, 1), (1, 1), (0, 0)))

        # --- 3x3 conv + "concatenation" straight into the aliased feature buffer
        feats = pl.pallas_call(
            _conv3x3_concat_kernel,
            out_shape=jax.ShapeDtypeStruct((n, h, w, cpad), jnp.float32),
            grid=(n,),
            in_specs=[
                pl.BlockSpec((1, h + 2, w + 2, cmidp), lambda b: (b, 0, 0, 0)),
                pl.BlockSpec((9, cmidp, cpad), lambda b: (0, 0, 0)),
                pl.BlockSpec((1, h, w, cpad), lambda b: (b, 0, 0, 0)),
            ],
            out_specs=pl.BlockSpec((1, h, w, cpad), lambda b: (b, 0, 0, 0)),
            input_output_aliases={2: 0},          # update the buffer in place (P8)
            compiler_params=parallel,
        )(u_pad, w2p, feats)

    # --- ECA on the full concatenation -------------------------------------
    ksz = eca_weight.shape[0]
    pad = (ksz - 1) // 2
    idx = jnp.arange(cpad)
    diff = idx[:, None] - idx[None, :]            # c' - c
    in_band = (jnp.abs(diff) <= pad) & (idx[:, None] < c_total) & (idx[None, :] < c_total)
    band = jnp.where(in_band, eca_weight[jnp.clip(diff + pad, 0, ksz - 1)], 0.0)
    band = band.astype(jnp.float32)               # (CPAD, CPAD) banded channel conv

    y = pl.pallas_call(
        _eca_kernel,
        out_shape=jax.ShapeDtypeStruct((n, h, w, cpad), jnp.float32),
        grid=(n,),
        in_specs=[
            pl.BlockSpec((1, h, w, cpad), lambda b: (b, 0, 0, 0)),
            pl.BlockSpec((cpad, cpad), lambda b: (0, 0)),
        ],
        out_specs=pl.BlockSpec((1, h, w, cpad), lambda b: (b, 0, 0, 0)),
        compiler_params=parallel,
    )(feats, band)

    # Single exit layout change back to NCHW.
    return jnp.transpose(y[..., :c_total], (0, 3, 1, 2))


# -----------------------------------------------------------------------------
# Pure-JAX (XLA) reference, full f32.
# -----------------------------------------------------------------------------
def reference_forward(x_nchw, layer_params, eca_weight, eps=1e-5):
    feats = x_nchw
    hi = jax.lax.Precision.HIGHEST
    for p in layer_params:
        s1 = p["g1"] / jnp.sqrt(p["v1"] + eps)
        b1 = p["b1"] - p["m1"] * s1
        hcur = jnp.maximum(feats * s1[None, :, None, None] + b1[None, :, None, None], 0.0)
        hcur = jax.lax.conv_general_dilated(
            hcur, p["w1"], (1, 1), "VALID",
            dimension_numbers=("NCHW", "OIHW", "NCHW"), precision=hi)
        s2 = p["g2"] / jnp.sqrt(p["v2"] + eps)
        b2 = p["b2"] - p["m2"] * s2
        hcur = jnp.maximum(hcur * s2[None, :, None, None] + b2[None, :, None, None], 0.0)
        new = jax.lax.conv_general_dilated(
            hcur, p["w2"], (1, 1), ((1, 1), (1, 1)),
            dimension_numbers=("NCHW", "OIHW", "NCHW"), precision=hi)
        feats = jnp.concatenate([feats, new], axis=1)
    c = feats.shape[1]
    k = eca_weight.shape[0]
    pad = (k - 1) // 2
    pooled = feats.mean(axis=(2, 3))
    pooled = jnp.pad(pooled, ((0, 0), (pad, pad)))
    attn = sum(pooled[:, d:d + c] * eca_weight[d] for d in range(k))
    attn = jax.nn.sigmoid(attn)
    return feats * attn[:, :, None, None]


if __name__ == "__main__":
    key = jax.random.PRNGKey(0)
    N, C0, H, W = 2, 4, 16, 16
    num_layers, growth_rate, bn_size = 3, 8, 4
    cmid = bn_size * growth_rate
    c_total = C0 + num_layers * growth_rate

    key, kx = jax.random.split(key)
    x = jax.random.normal(kx, (N, C0, H, W), dtype=jnp.float32)

    layer_params = []
    for i in range(num_layers):
        cin = C0 + i * growth_rate
        key, *ks = jax.random.split(key, 11)
        layer_params.append(dict(
            g1=jax.random.uniform(ks[0], (cin,), minval=0.5, maxval=1.5),
            b1=0.1 * jax.random.normal(ks[1], (cin,)),
            m1=0.1 * jax.random.normal(ks[2], (cin,)),
            v1=jax.random.uniform(ks[3], (cin,), minval=0.5, maxval=1.5),
            w1=jax.random.uniform(ks[4], (cmid, cin, 1, 1), minval=-1.0, maxval=1.0)
               / (cin ** 0.5),
            g2=jax.random.uniform(ks[5], (cmid,), minval=0.5, maxval=1.5),
            b2=0.1 * jax.random.normal(ks[6], (cmid,)),
            m2=0.1 * jax.random.normal(ks[7], (cmid,)),
            v2=jax.random.uniform(ks[8], (cmid,), minval=0.5, maxval=1.5),
            w2=jax.random.uniform(ks[9], (growth_rate, cmid, 3, 3), minval=-1.0, maxval=1.0)
               / ((cmid * 9) ** 0.5),
        ))

    # ECA kernel size from the module's formula (gamma=2, b=1).
    ksz = int(abs((math.log(c_total, 2) + 1) / 2))
    ksz = ksz if ksz % 2 else ksz + 1
    key, ke = jax.random.split(key)
    eca_w = jax.random.uniform(ke, (ksz,), minval=-1.0, maxval=1.0) / (ksz ** 0.5)

    fwd = jax.jit(dense_block_eca_forward, static_argnames=("compute_dtype",))

    out_bf16 = jax.block_until_ready(fwd(x, layer_params, eca_w))                       # bf16 MXU path
    out_f32 = jax.block_until_ready(fwd(x, layer_params, eca_w, compute_dtype=jnp.float32))
    ref = reference_forward(x, layer_params, eca_w)

    assert out_bf16.shape == (N, c_total, H, W), out_bf16.shape
    assert out_f32.shape == (N, c_total, H, W), out_f32.shape
    # f32 compute path: tight structural check against the XLA reference.
    assert jnp.allclose(out_f32, ref, atol=2e-2, rtol=2e-2), \
        float(jnp.max(jnp.abs(out_f32 - ref)))
    # bf16 MXU-input path: loosened tolerance (expected bf16 rounding).
    assert jnp.allclose(out_bf16, ref, atol=1e-1, rtol=1e-1), \
        float(jnp.max(jnp.abs(out_bf16 - ref)))
    print("KERNEL_OK")
</pallas_src>

<mosaic_0001>
module attributes {stable_mosaic.version = 11 : i64} {
  func.func @_bottleneck_kernel(%arg0: i32, %arg1: memref<1x16x16x128xf32, #tpu.memory_space<vmem>>, %arg2: memref<1x128xf32, #tpu.memory_space<vmem>>, %arg3: memref<1x128xf32, #tpu.memory_space<vmem>>, %arg4: memref<128x128xbf16, #tpu.memory_space<vmem>>, %arg5: memref<1x128xf32, #tpu.memory_space<vmem>>, %arg6: memref<1x128xf32, #tpu.memory_space<vmem>>, %arg7: memref<1x16x16x128xf32, #tpu.memory_space<vmem>>) attributes {dimension_semantics = [#tpu.dimension_semantics<parallel>], iteration_bounds = array<i64: 2>, scalar_prefetch = 0 : i64, scratch_operands = 0 : i64, tpu.core_type = #tpu.core_type<tc>, window_params = [{transform_indices = @transform_0, window_bounds = array<i64: 1, 16, 16, 128>}, {pipeline_mode = #tpu.pipeline_mode<synchronous>, transform_indices = @transform_1, window_bounds = array<i64: 1, 128>}, {pipeline_mode = #tpu.pipeline_mode<synchronous>, transform_indices = @transform_2, window_bounds = array<i64: 1, 128>}, {pipeline_mode = #tpu.pipeline_mode<synchronous>, transform_indices = @transform_3, window_bounds = array<i64: 128, 128>}, {pipeline_mode = #tpu.pipeline_mode<synchronous>, transform_indices = @transform_4, window_bounds = array<i64: 1, 128>}, {pipeline_mode = #tpu.pipeline_mode<synchronous>, transform_indices = @transform_5, window_bounds = array<i64: 1, 128>}, {transform_indices = @transform_6, window_bounds = array<i64: 1, 16, 16, 128>}]} {
    %c0 = arith.constant 0 : index
    %c0_0 = arith.constant 0 : index
    %c0_1 = arith.constant 0 : index
    %c0_2 = arith.constant 0 : index
    %0 = vector.load %arg1[%c0, %c0_0, %c0_1, %c0_2] : memref<1x16x16x128xf32, #tpu.memory_space<vmem>>, vector<1x16x16x128xf32>
    %1 = vector.shape_cast %0 : vector<1x16x16x128xf32> to vector<256x128xf32>
    %c0_3 = arith.constant 0 : index
    %c0_4 = arith.constant 0 : index
    %2 = vector.load %arg2[%c0_3, %c0_4] : memref<1x128xf32, #tpu.memory_space<vmem>>, vector<1x128xf32>
    %3 = vector.broadcast %2 : vector<1x128xf32> to vector<256x128xf32>
    %4 = arith.mulf %1, %3 : vector<256x128xf32>
    %c0_5 = arith.constant 0 : index
    %c0_6 = arith.constant 0 : index
    %5 = vector.load %arg3[%c0_5, %c0_6] : memref<1x128xf32, #tpu.memory_space<vmem>>, vector<1x128xf32>
    %6 = vector.broadcast %5 : vector<1x128xf32> to vector<256x128xf32>
    %7 = arith.addf %4, %6 : vector<256x128xf32>
    %cst = arith.constant 0.000000e+00 : f32
    %8 = vector.broadcast %cst : f32 to vector<256x128xf32>
    %9 = arith.maximumf %7, %8 : vector<256x128xf32>
    %10 = arith.truncf %9 : vector<256x128xf32> to vector<256x128xbf16>
    %c0_7 = arith.constant 0 : index
    %c0_8 = arith.constant 0 : index
    %11 = vector.load %arg4[%c0_7, %c0_8] : memref<128x128xbf16, #tpu.memory_space<vmem>>, vector<128x128xbf16>
    %cst_9 = arith.constant dense<0.000000e+00> : vector<256x128xf32>
    %12 = tpu.matmul %10, %11, %cst_9 {dimension_numbers = #tpu.dot_dimension_numbers<[1], [0], [0], [1], [0, 0, 1, 1], [], []>} : vector<256x128xbf16>, vector<128x128xbf16>, vector<256x128xf32> -> vector<256x128xf32>
    %c0_10 = arith.constant 0 : index
    %c0_11 = arith.constant 0 : index
    %13 = vector.load %arg5[%c0_10, %c0_11] : memref<1x128xf32, #tpu.memory_space<vmem>>, vector<1x128xf32>
    %14 = vector.broadcast %13 : vector<1x128xf32> to vector<256x128xf32>
    %15 = arith.mulf %12, %14 : vector<256x128xf32>
    %c0_12 = arith.constant 0 : index
    %c0_13 = arith.constant 0 : index
    %16 = vector.load %arg6[%c0_12, %c0_13] : memref<1x128xf32, #tpu.memory_space<vmem>>, vector<1x128xf32>
    %17 = vector.broadcast %16 : vector<1x128xf32> to vector<256x128xf32>
    %18 = arith.addf %15, %17 : vector<256x128xf32>
    %cst_14 = arith.constant 0.000000e+00 : f32
    %19 = vector.broadcast %cst_14 : f32 to vector<256x128xf32>
    %20 = arith.maximumf %18, %19 : vector<256x128xf32>
    %21 = vector.shape_cast %20 : vector<256x128xf32> to vector<1x16x16x128xf32>
    %c0_15 = arith.constant 0 : index
    %c0_16 = arith.constant 0 : index
    %c0_17 = arith.constant 0 : index
    %c0_18 = arith.constant 0 : index
    %22 = vector.load %arg7[%c0_15, %c0_16, %c0_17, %c0_18] : memref<1x16x16x128xf32, #tpu.memory_space<vmem>>, vector<1x16x16x128xf32>
    tpu.vector_store %arg7[%c0_15, %c0_16, %c0_17, %c0_18], %21 {strides = array<i32>} : memref<1x16x16x128xf32, #tpu.memory_space<vmem>>, vector<1x16x16x128xf32>,
    return
  }
  func.func @transform_0(%arg0: i32) -> (i32, i32, i32, i32) {
    %c0_i32 = arith.constant 0 : i32
    %c0_i32_0 = arith.constant 0 : i32
    %c0_i32_1 = arith.constant 0 : i32
    %c0_i32_2 = arith.constant 0 : i32
    return %arg0, %c0_i32, %c0_i32_0, %c0_i32_1 : i32, i32, i32, i32
  }
  func.func @transform_1(%arg0: i32) -> (i32, i32) {
    %c0_i32 = arith.constant 0 : i32
    %c0_i32_0 = arith.constant 0 : i32
    %c0_i32_1 = arith.constant 0 : i32
    return %c0_i32, %c0_i32_0 : i32, i32
  }
  func.func @transform_2(%arg0: i32) -> (i32, i32) {
    %c0_i32 = arith.constant 0 : i32
    %c0_i32_0 = arith.constant 0 : i32
    %c0_i32_1 = arith.constant 0 : i32
    return %c0_i32, %c0_i32_0 : i32, i32
  }
  func.func @transform_3(%arg0: i32) -> (i32, i32) {
    %c0_i32 = arith.constant 0 : i32
    %c0_i32_0 = arith.constant 0 : i32
    %c0_i32_1 = arith.constant 0 : i32
    return %c0_i32, %c0_i32_0 : i32, i32
  }
  func.func @transform_4(%arg0: i32) -> (i32, i32) {
    %c0_i32 = arith.constant 0 : i32
    %c0_i32_0 = arith.constant 0 : i32
    %c0_i32_1 = arith.constant 0 : i32
    return %c0_i32, %c0_i32_0 : i32, i32
  }
  func.func @transform_5(%arg0: i32) -> (i32, i32) {
    %c0_i32 = arith.constant 0 : i32
    %c0_i32_0 = arith.constant 0 : i32
    %c0_i32_1 = arith.constant 0 : i32
    return %c0_i32, %c0_i32_0 : i32, i32
  }
  func.func @transform_6(%arg0: i32) -> (i32, i32, i32, i32) {
    %c0_i32 = arith.constant 0 : i32
    %c0_i32_0 = arith.constant 0 : i32
    %c0_i32_1 = arith.constant 0 : i32
    %c0_i32_2 = arith.constant 0 : i32
    return %arg0, %c0_i32, %c0_i32_0, %c0_i32_1 : i32, i32, i32, i32
  }
}

module attributes {stable_mosaic.version = 11 : i64} {
  func.func @_conv3x3_concat_kernel(%arg0: i32, %arg1: memref<1x18x18x128xf32, #tpu.memory_space<vmem>>, %arg2: memref<9x128x128xbf16, #tpu.memory_space<vmem>>, %arg3: memref<1x16x16x128xf32, #tpu.memory_space<vmem>>, %arg4: memref<1x16x16x128xf32, #tpu.memory_space<vmem>>) attributes {dimension_semantics = [#tpu.dimension_semantics<parallel>], iteration_bounds = array<i64: 2>, scalar_prefetch = 0 : i64, scratch_operands = 0 : i64, tpu.core_type = #tpu.core_type<tc>, window_params = [{transform_indices = @transform_0, window_bounds = array<i64: 1, 18, 18, 128>}, {pipeline_mode = #tpu.pipeline_mode<synchronous>, transform_indices = @transform_1, window_bounds = array<i64: 9, 128, 128>}, {transform_indices = @transform_2, window_bounds = array<i64: 1, 16, 16, 128>}, {transform_indices = @transform_3, window_bounds = array<i64: 1, 16, 16, 128>}]} {
    %cst = arith.constant 0.000000e+00 : f32
    %0 = vector.broadcast %cst : f32 to vector<256x128xf32>
    %c0 = arith.constant 0 : index
    %c0_0 = arith.constant 0 : index
    %c0_1 = arith.constant 0 : index
    %c0_2 = arith.constant 0 : index
    %1 = vector.load %arg1[%c0, %c0_0, %c0_1, %c0_2] : memref<1x18x18x128xf32, #tpu.memory_space<vmem>>, vector<1x16x16x128xf32>
    %2 = vector.shape_cast %1 : vector<1x16x16x128xf32> to vector<16x16x128xf32>
    %3 = vector.shape_cast %2 : vector<16x16x128xf32> to vector<256x128xf32>
    %4 = arith.truncf %3 : vector<256x128xf32> to vector<256x128xbf16>
    %c0_3 = arith.constant 0 : index
    %c0_4 = arith.constant 0 : index
    %c0_5 = arith.constant 0 : index
    %5 = vector.load %arg2[%c0_3, %c0_4, %c0_5] : memref<9x128x128xbf16, #tpu.memory_space<vmem>>, vector<1x128x128xbf16>
    %6 = vector.shape_cast %5 : vector<1x128x128xbf16> to vector<128x128xbf16>
    %cst_6 = arith.constant dense<0.000000e+00> : vector<256x128xf32>
    %7 = tpu.matmul %4, %6, %cst_6 {dimension_numbers = #tpu.dot_dimension_numbers<[1], [0], [0], [1], [0, 0, 1, 1], [], []>} : vector<256x128xbf16>, vector<128x128xbf16>, vector<256x128xf32> -> vector<256x128xf32>
    %8 = arith.addf %0, %7 : vector<256x128xf32>
    %c0_7 = arith.constant 0 : index
    %c0_8 = arith.constant 0 : index
    %c1 = arith.constant 1 : index
    %c0_9 = arith.constant 0 : index
    %9 = vector.load %arg1[%c0_7, %c0_8, %c1, %c0_9] : memref<1x18x18x128xf32, #tpu.memory_space<vmem>>, vector<1x16x16x128xf32>
    %10 = vector.shape_cast %9 : vector<1x16x16x128xf32> to vector<16x16x128xf32>
    %11 = vector.shape_cast %10 : vector<16x16x128xf32> to vector<256x128xf32>
    %12 = arith.truncf %11 : vector<256x128xf32> to vector<256x128xbf16>
    %c1_10 = arith.constant 1 : index
    %c0_11 = arith.constant 0 : index
    %c0_12 = arith.constant 0 : index
    %13 = vector.load %arg2[%c1_10, %c0_11, %c0_12] : memref<9x128x128xbf16, #tpu.memory_space<vmem>>, vector<1x128x128xbf16>
    %14 = vector.shape_cast %13 : vector<1x128x128xbf16> to vector<128x128xbf16>
    %cst_13 = arith.constant dense<0.000000e+00> : vector<256x128xf32>
    %15 = tpu.matmul %12, %14, %cst_13 {dimension_numbers = #tpu.dot_dimension_numbers<[1], [0], [0], [1], [0, 0, 1, 1], [], []>} : vector<256x128xbf16>, vector<128x128xbf16>, vector<256x128xf32> -> vector<256x128xf32>
    %16 = arith.addf %8, %15 : vector<256x128xf32>
    %c0_14 = arith.constant 0 : index
    %c0_15 = arith.constant 0 : index
    %c2 = arith.constant 2 : index
    %c0_16 = arith.constant 0 : index
    %17 = vector.load %arg1[%c0_14, %c0_15, %c2, %c0_16] : memref<1x18x18x128xf32, #tpu.memory_space<vmem>>, vector<1x16x16x128xf32>
    %18 = vector.shape_cast %17 : vector<1x16x16x128xf32> to vector<16x16x128xf32>
    %19 = vector.shape_cast %18 : vector<16x16x128xf32> to vector<256x128xf32>
    %20 = arith.truncf %19 : vector<256x128xf32> to vector<256x128xbf16>
    %c2_17 = arith.constant 2 : index
    %c0_18 = arith.constant 0 : index
    %c0_19 = arith.constant 0 : index
    %21 = vector.load %arg2[%c2_17, %c0_18, %c0_19] : memref<9x128x128xbf16, #tpu.memory_space<vmem>>, vector<1x128x128xbf16>
    %22 = vector.shape_cast %21 : vector<1x128x128xbf16> to vector<128x128xbf16>
    %cst_20 = arith.constant dense<0.000000e+00> : vector<256x128xf32>
    %23 = tpu.matmul %20, %22, %cst_20 {dimension_numbers = #tpu.dot_dimension_numbers<[1], [0], [0], [1], [0, 0, 1, 1], [], []>} : vector<256x128xbf16>, vector<128x128xbf16>, vector<256x128xf32> -> vector<256x128xf32>
    %24 = arith.addf %16, %23 : vector<256x128xf32>
    %c0_21 = arith.constant 0 : index
    %c1_22 = arith.constant 1 : index
    %c0_23 = arith.constant 0 : index
    %c0_24 = arith.constant 0 : index
    %25 = vector.load %arg1[%c0_21, %c1_22, %c0_23, %c0_24] : memref<1x18x18x128xf32, #tpu.memory_space<vmem>>, vector<1x16x16x128xf32>
    %26 = vector.shape_cast %25 : vector<1x16x16x128xf32> to vector<16x16x128xf32>
    %27 = vector.shape_cast %26 : vector<16x16x128xf32> to vector<256x128xf32>
    %28 = arith.truncf %27 : vector<256x128xf32> to vector<256x128xbf16>
    %c3 = arith.constant 3 : index
    %c0_25 = arith.constant 0 : index
    %c0_26 = arith.constant 0 : index
    %29 = vector.load %arg2[%c3, %c0_25, %c0_26] : memref<9x128x128xbf16, #tpu.memory_space<vmem>>, vector<1x128x128xbf16>
    %30 = vector.shape_cast %29 : vector<1x128x128xbf16> to vector<128x128xbf16>
    %cst_27 = arith.constant dense<0.000000e+00> : vector<256x128xf32>
    %31 = tpu.matmul %28, %30, %cst_27 {dimension_numbers = #tpu.dot_dimension_numbers<[1], [0], [0], [1], [0, 0, 1, 1], [], []>} : vector<256x128xbf16>, vector<128x128xbf16>, vector<256x128xf32> -> vector<256x128xf32>
    %32 = arith.addf %24, %31 : vector<256x128xf32>
    %c0_28 = arith.constant 0 : index
    %c1_29 = arith.constant 1 : index
    %c1_30 = arith.constant 1 : index
    %c0_31 = arith.constant 0 : index
    %33 = vector.load %arg1[%c0_28, %c1_29, %c1_30, %c0_31] : memref<1x18x18x128xf32, #tpu.memory_space<vmem>>, vector<1x16x16x128xf32>
    %34 = vector.shape_cast %33 : vector<1x16x16x128xf32> to vector<16x16x128xf32>
    %35 = vector.shape_cast %34 : vector<16x16x128xf32> to vector<256x128xf32>
    %36 = arith.truncf %35 : vector<256x128xf32> to vector<256x128xbf16>
    %c4 = arith.constant 4 : index
    %c0_32 = arith.constant 0 : index
    %c0_33 = arith.constant 0 : index
    %37 = vector.load %arg2[%c4, %c0_32, %c0_33] : memref<9x128x128xbf16, #tpu.memory_space<vmem>>, vector<1x128x128xbf16>
    %38 = vector.shape_cast %37 : vector<1x128x128xbf16> to vector<128x128xbf16>
    %cst_34 = arith.constant dense<0.000000e+00> : vector<256x128xf32>
    %39 = tpu.matmul %36, %38, %cst_34 {dimension_numbers = #tpu.dot_dimension_numbers<[1], [0], [0], [1], [0, 0, 1, 1], [], []>} : vector<256x128xbf16>, vector<128x128xbf16>, vector<256x128xf32> -> vector<256x128xf32>
    %40 = arith.addf %32, %39 : vector<256x128xf32>
    %c0_35 = arith.constant 0 : index
    %c1_36 = arith.constant 1 : index
    %c2_37 = arith.constant 2 : index
    %c0_38 = arith.constant 0 : index
    %41 = vector.load %arg1[%c0_35, %c1_36, %c2_37, %c0_38] : memref<1x18x18x128xf32, #tpu.memory_space<vmem>>, vector<1x16x16x128xf32>
    %42 = vector.shape_cast %41 : vector<1x16x16x128xf32> to vector<16x16x128xf32>
    %43 = vector.shape_cast %42 : vector<16x16x128xf32> to vector<256x128xf32>
    %44 = arith.truncf %43 : vector<256x128xf32> to vector<256x128xbf16>
    %c5 = arith.constant 5 : index
    %c0_39 = arith.constant 0 : index
    %c0_40 = arith.constant 0 : index
    %45 = vector.load %arg2[%c5, %c0_39, %c0_40] : memref<9x128x128xbf16, #tpu.memory_space<vmem>>, vector<1x128x128xbf16>
    %46 = vector.shape_cast %45 : vector<1x128x128xbf16> to vector<128x128xbf16>
    %cst_41 = arith.constant dense<0.000000e+00> : vector<256x128xf32>
    %47 = tpu.matmul %44, %46, %cst_41 {dimension_numbers = #tpu.dot_dimension_numbers<[1], [0], [0], [1], [0, 0, 1, 1], [], []>} : vector<256x128xbf16>, vector<128x128xbf16>, vector<256x128xf32> -> vector<256x128xf32>
    %48 = arith.addf %40, %47 : vector<256x128xf32>
    %c0_42 = arith.constant 0 : index
    %c2_43 = arith.constant 2 : index
    %c0_44 = arith.constant 0 : index
    %c0_45 = arith.constant 0 : index
    %49 = vector.load %arg1[%c0_42, %c2_43, %c0_44, %c0_45] : memref<1x18x18x128xf32, #tpu.memory_space<vmem>>, vector<1x16x16x128xf32>
    %50 = vector.shape_cast %49 : vector<1x16x16x128xf32> to vector<16x16x128xf32>
    %51 = vector.shape_cast %50 : vector<16x16x128xf32> to vector<256x128xf32>
    %52 = arith.truncf %51 : vector<256x128xf32> to vector<256x128xbf16>
    %c6 = arith.constant 6 : index
    %c0_46 = arith.constant 0 : index
    %c0_47 = arith.constant 0 : index
    %53 = vector.load %arg2[%c6, %c0_46, %c0_47] : memref<9x128x128xbf16, #tpu.memory_space<vmem>>, vector<1x128x128xbf16>
    %54 = vector.shape_cast %53 : vector<1x128x128xbf16> to vector<128x128xbf16>
    %cst_48 = arith.constant dense<0.000000e+00> : vector<256x128xf32>
    %55 = tpu.matmul %52, %54, %cst_48 {dimension_numbers = #tpu.dot_dimension_numbers<[1], [0], [0], [1], [0, 0, 1, 1], [], []>} : vector<256x128xbf16>, vector<128x128xbf16>, vector<256x128xf32> -> vector<256x128xf32>
    %56 = arith.addf %48, %55 : vector<256x128xf32>
    %c0_49 = arith.constant 0 : index
    %c2_50 = arith.constant 2 : index
    %c1_51 = arith.constant 1 : index
    %c0_52 = arith.constant 0 : index
    %57 = vector.load %arg1[%c0_49, %c2_50, %c1_51, %c0_52] : memref<1x18x18x128xf32, #tpu.memory_space<vmem>>, vector<1x16x16x128xf32>
    %58 = vector.shape_cast %57 : vector<1x16x16x128xf32> to vector<16x16x128xf32>
    %59 = vector.shape_cast %58 : vector<16x16x128xf32> to vector<256x128xf32>
    %60 = arith.truncf %59 : vector<256x128xf32> to vector<256x128xbf16>
    %c7 = arith.constant 7 : index
    %c0_53 = arith.constant 0 : index
    %c0_54 = arith.constant 0 : index
    %61 = vector.load %arg2[%c7, %c0_53, %c0_54] : memref<9x128x128xbf16, #tpu.memory_space<vmem>>, vector<1x128x128xbf16>
    %62 = vector.shape_cast %61 : vector<1x128x128xbf16> to vector<128x128xbf16>
    %cst_55 = arith.constant dense<0.000000e+00> : vector<256x128xf32>
    %63 = tpu.matmul %60, %62, %cst_55 {dimension_numbers = #tpu.dot_dimension_numbers<[1], [0], [0], [1], [0, 0, 1, 1], [], []>} : vector<256x128xbf16>, vector<128x128xbf16>, vector<256x128xf32> -> vector<256x128xf32>
    %64 = arith.addf %56, %63 : vector<256x128xf32>
    %c0_56 = arith.constant 0 : index
    %c2_57 = arith.constant 2 : index
    %c2_58 = arith.constant 2 : index
    %c0_59 = arith.constant 0 : index
    %65 = vector.load %arg1[%c0_56, %c2_57, %c2_58, %c0_59] : memref<1x18x18x128xf32, #tpu.memory_space<vmem>>, vector<1x16x16x128xf32>
    %66 = vector.shape_cast %65 : vector<1x16x16x128xf32> to vector<16x16x128xf32>
    %67 = vector.shape_cast %66 : vector<16x16x128xf32> to vector<256x128xf32>
    %68 = arith.truncf %67 : vector<256x128xf32> to vector<256x128xbf16>
    %c8 = arith.constant 8 : index
    %c0_60 = arith.constant 0 : index
    %c0_61 = arith.constant 0 : index
    %69 = vector.load %arg2[%c8, %c0_60, %c0_61] : memref<9x128x128xbf16, #tpu.memory_space<vmem>>, vector<1x128x128xbf16>
    %70 = vector.shape_cast %69 : vector<1x128x128xbf16> to vector<128x128xbf16>
    %cst_62 = arith.constant dense<0.000000e+00> : vector<256x128xf32>
    %71 = tpu.matmul %68, %70, %cst_62 {dimension_numbers = #tpu.dot_dimension_numbers<[1], [0], [0], [1], [0, 0, 1, 1], [], []>} : vector<256x128xbf16>, vector<128x128xbf16>, vector<256x128xf32> -> vector<256x128xf32>
    %72 = arith.addf %64, %71 : vector<256x128xf32>
    %c0_63 = arith.constant 0 : index
    %c0_64 = arith.constant 0 : index
    %c0_65 = arith.constant 0 : index
    %c0_66 = arith.constant 0 : index
    %73 = vector.load %arg3[%c0_63, %c0_64, %c0_65, %c0_66] : memref<1x16x16x128xf32, #tpu.memory_space<vmem>>, vector<1x16x16x128xf32>
    %74 = vector.shape_cast %72 : vector<256x128xf32> to vector<1x16x16x128xf32>
    %75 = arith.addf %73, %74 : vector<1x16x16x128xf32>
    %c0_67 = arith.constant 0 : index
    %c0_68 = arith.constant 0 : index
    %c0_69 = arith.constant 0 : index
    %c0_70 = arith.constant 0 : index
    %76 = vector.load %arg4[%c0_67, %c0_68, %c0_69, %c0_70] : memref<1x16x16x128xf32, #tpu.memory_space<vmem>>, vector<1x16x16x128xf32>
    tpu.vector_store %arg4[%c0_67, %c0_68, %c0_69, %c0_70], %75 {strides = array<i32>} : memref<1x16x16x128xf32, #tpu.memory_space<vmem>>, vector<1x16x16x128xf32>,
    return
  }
  func.func @transform_0(%arg0: i32) -> (i32, i32, i32, i32) {
    %c0_i32 = arith.constant 0 : i32
    %c0_i32_0 = arith.constant 0 : i32
    %c0_i32_1 = arith.constant 0 : i32
    %c0_i32_2 = arith.constant 0 : i32
    return %arg0, %c0_i32, %c0_i32_0, %c0_i32_1 : i32, i32, i32, i32
  }
  func.func @transform_1(%arg0: i32) -> (i32, i32, i32) {
    %c0_i32 = arith.constant 0 : i32
    %c0_i32_0 = arith.constant 0 : i32
    %c0_i32_1 = arith.constant 0 : i32
    %c0_i32_2 = arith.constant 0 : i32
    return %c0_i32, %c0_i32_0, %c0_i32_1 : i32, i32, i32
  }
  func.func @transform_2(%arg0: i32) -> (i32, i32, i32, i32) {
    %c0_i32 = arith.constant 0 : i32
    %c0_i32_0 = arith.constant 0 : i32
    %c0_i32_1 = arith.constant 0 : i32
    %c0_i32_2 = arith.constant 0 : i32
    return %arg0, %c0_i32, %c0_i32_0, %c0_i32_1 : i32, i32, i32, i32
  }
  func.func @transform_3(%arg0: i32) -> (i32, i32, i32, i32) {
    %c0_i32 = arith.constant 0 : i32
    %c0_i32_0 = arith.constant 0 : i32
    %c0_i32_1 = arith.constant 0 : i32
    %c0_i32_2 = arith.constant 0 : i32
    return %arg0, %c0_i32, %c0_i32_0, %c0_i32_1 : i32, i32, i32, i32
  }
}

module attributes {stable_mosaic.version = 11 : i64} {
  func.func @_eca_kernel(%arg0: i32, %arg1: memref<1x16x16x128xf32, #tpu.memory_space<vmem>>, %arg2: memref<128x128xf32, #tpu.memory_space<vmem>>, %arg3: memref<1x16x16x128xf32, #tpu.memory_space<vmem>>) attributes {dimension_semantics = [#tpu.dimension_semantics<parallel>], iteration_bounds = array<i64: 2>, scalar_prefetch = 0 : i64, scratch_operands = 0 : i64, tpu.core_type = #tpu.core_type<tc>, window_params = [{transform_indices = @transform_0, window_bounds = array<i64: 1, 16, 16, 128>}, {pipeline_mode = #tpu.pipeline_mode<synchronous>, transform_indices = @transform_1, window_bounds = array<i64: 128, 128>}, {transform_indices = @transform_2, window_bounds = array<i64: 1, 16, 16, 128>}]} {
    %c0 = arith.constant 0 : index
    %c0_0 = arith.constant 0 : index
    %c0_1 = arith.constant 0 : index
    %c0_2 = arith.constant 0 : index
    %0 = vector.load %arg1[%c0, %c0_0, %c0_1, %c0_2] : memref<1x16x16x128xf32, #tpu.memory_space<vmem>>, vector<1x16x16x128xf32>
    %1 = vector.shape_cast %0 : vector<1x16x16x128xf32> to vector<256x128xf32>
    %cst = arith.constant dense<0.000000e+00> : vector<128xf32>
    %2 = vector.multi_reduction <add>, %1, %cst [0] : vector<256x128xf32> to vector<128xf32>
    %3 = vector.shape_cast %2 : vector<128xf32> to vector<1x128xf32>
    %cst_3 = arith.constant 2.560000e+02 : f32
    %4 = vector.broadcast %cst_3 : f32 to vector<1x128xf32>
    %5 = arith.divf %3, %4 : vector<1x128xf32>
    %c0_4 = arith.constant 0 : index
    %c0_5 = arith.constant 0 : index
    %6 = vector.load %arg2[%c0_4, %c0_5] : memref<128x128xf32, #tpu.memory_space<vmem>>, vector<128x128xf32>
    %cst_6 = arith.constant dense<0.000000e+00> : vector<1x128xf32>
    %7 = tpu.matmul %5, %6, %cst_6 {dimension_numbers = #tpu.dot_dimension_numbers<[1], [0], [0], [1], [0, 0, 1, 1], [], []>} : vector<1x128xf32>, vector<128x128xf32>, vector<1x128xf32> -> vector<1x128xf32>
    %cst_7 = arith.constant 0.000000e+00 : f32
    %8 = vector.broadcast %cst_7 : f32 to vector<1x128xf32>
    %9 = arith.subf %8, %7 : vector<1x128xf32>
    %10 = math.exp %9 : vector<1x128xf32>
    %cst_8 = arith.constant 1.000000e+00 : f32
    %11 = vector.broadcast %cst_8 : f32 to vector<1x128xf32>
    %12 = arith.addf %11, %10 : vector<1x128xf32>
    %cst_9 = arith.constant 1.000000e+00 : f32
    %13 = vector.broadcast %cst_9 : f32 to vector<1x128xf32>
    %14 = arith.divf %13, %12 : vector<1x128xf32>
    %15 = vector.broadcast %14 : vector<1x128xf32> to vector<256x128xf32>
    %16 = arith.mulf %1, %15 : vector<256x128xf32>
    %17 = vector.shape_cast %16 : vector<256x128xf32> to vector<1x16x16x128xf32>
    %c0_10 = arith.constant 0 : index
    %c0_11 = arith.constant 0 : index
    %c0_12 = arith.constant 0 : index
    %c0_13 = arith.constant 0 : index
    %18 = vector.load %arg3[%c0_10, %c0_11, %c0_12, %c0_13] : memref<1x16x16x128xf32, #tpu.memory_space<vmem>>, vector<1x16x16x128xf32>
    tpu.vector_store %arg3[%c0_10, %c0_11, %c0_12, %c0_13], %17 {strides = array<i32>} : memref<1x16x16x128xf32, #tpu.memory_space<vmem>>, vector<1x16x16x128xf32>,
    return
  }
  func.func @transform_0(%arg0: i32) -> (i32, i32, i32, i32) {
    %c0_i32 = arith.constant 0 : i32
    %c0_i32_0 = arith.constant 0 : i32
    %c0_i32_1 = arith.constant 0 : i32
    %c0_i32_2 = arith.constant 0 : i32
    return %arg0, %c0_i32, %c0_i32_0, %c0_i32_1 : i32, i32, i32, i32
  }
  func.func @transform_1(%arg0: i32) -> (i32, i32) {
    %c0_i32 = arith.constant 0 : i32
    %c0_i32_0 = arith.constant 0 : i32
    %c0_i32_1 = arith.constant 0 : i32
    return %c0_i32, %c0_i32_0 : i32, i32
  }
  func.func @transform_2(%arg0: i32) -> (i32, i32, i32, i32) {
    %c0_i32 = arith.constant 0 : i32
    %c0_i32_0 = arith.constant 0 : i32
    %c0_i32_1 = arith.constant 0 : i32
    %c0_i32_2 = arith.constant 0 : i32
    return %arg0, %c0_i32, %c0_i32_0, %c0_i32_1 : i32, i32, i32, i32
  }
}

</mosaic_0001>

<bundles_post_ra>
// kernel: dense_block_eca_forward.7
= control target key start
LH: loop header
LB: loop body
LE: loop exit
PB: predicated region body
PF: predicated region fallthrough
CT: control target
= control target key end

     0   :  { %s1005_s21 = smov 0   ;;  %s1269_s0 = inlined_call_operand.vmem [shape: f32[2,16,16,128], index: 0, kind: input, shape index: {}]   ;;  %s1270_s1 = inlined_call_operand.vmem [shape: f32[1,128], index: 1, kind: input, shape index: {}]   ;;  %s1271_s2 = inlined_call_operand.vmem [shape: f32[1,128], index: 2, kind: input, shape index: {}]   ;;  %s1272_s3 = inlined_call_operand.vmem [shape: bf16[128,128], index: 3, kind: input, shape index: {}]   ;;  %s1273_s4 = inlined_call_operand.vmem [shape: f32[1,128], index: 4, kind: input, shape index: {}]   ;;  %s1274_s5 = inlined_call_operand.vmem [shape: f32[1,128], index: 5, kind: input, shape index: {}]   ;;  %s1275_s6 = inlined_call_operand.vmem [shape: f32[2,16,16,128], index: 6, kind: output, shape index: {}]  }
   0x1 LB: > { %s833_s22 = sadd.s32 4294967295, %s968_s21   ;;  %p837_p0 = scmp.ge.s32.totalorder %s968_s21, 1  ;;  %s968_s21 = sphi %s1005_s21, %s16_s21  }
   0x2   : > { %p212_p1 = scmp.lt.s32.totalorder %s968_s21, 3 }
   0x4   : > { %p213_p2 = pnand %p837_p0, %p212_p1 }
   0x5   : > { %v954_v0 = vld [vmem:[%s1272_s3] sm:$0xff] (!%p213_p2)   ;;  %p242_p3 = scmp.lt.s32.totalorder (!%p213_p2), %s833_s22, 1  ;;  %v955_v1 = vld [vmem:[%s1272_s3 + $0x8] sm:$0xff] (!%p213_p2)   ;;  %v956_v2 = vld [vmem:[%s1272_s3 + $0x10] sm:$0xff] (!%p213_p2)  }
   0x6   : > { %216 = sbr.rel (%p213_p2) target bundleno = 284 (0x11c), region = 44  ;;  %882 = vmatprep.subr.bf16.mxu0 (!%p213_p2), %v954_v0  ;;  %930 = vmatprep.subr.bf16.mxu1 (!%p213_p2), %v954_v0  ;;  %v957_v3 = vld [vmem:[%s1272_s3 + $0x18] sm:$0xff] (!%p213_p2)   ;;  %v1040_v6 = vld [vmem:[%s1270_s1] ss:$0 sm:$0xff] (!%p213_p2)  ;;  %v959_v30 = vld [vmem:[%s1272_s3 + $0x28] sm:$0xff] (!%p213_p2)  }
   0x7   : > { %883 = vmatpush3.bf16.msra.mxu0 (!%p213_p2), %v954_v0  ;;  %938 = vmatpush3.bf16.msra.mxu1 (!%p213_p2), %v954_v0  ;;  %v1047_v9 = vld [vmem:[%s1271_s2] ss:$0 sm:$0xff] (!%p213_p2)  ;;  %v960_v42 = vld [vmem:[%s1272_s3 + $0x30] sm:$0xff] (!%p213_p2)   ;;  %v961_v60 = vld [vmem:[%s1272_s3 + $0x38] sm:$0xff] (!%p213_p2)  }
   0x8   : > { %884 = vmatprep.subr.bf16.mxu0 (!%p213_p2), %v955_v1  ;;  %931 = vmatprep.subr.bf16.mxu1 (!%p213_p2), %v955_v1  ;;  %v958_v16 = vld [vmem:[%s1272_s3 + $0x20] sm:$0xff] (!%p213_p2)  }
   0xb   : > { %885 = vmatpush3.bf16.msra.mxu0 (!%p213_p2), %v955_v1  ;;  %939 = vmatpush3.bf16.msra.mxu1 (!%p213_p2), %v955_v1 }
   0xc   : > { %886 = vmatprep.subr.bf16.mxu0 (!%p213_p2), %v956_v2  ;;  %932 = vmatprep.subr.bf16.mxu1 (!%p213_p2), %v956_v2 }
   0xd   : > { %s1277_s22 = smov (!%p242_p3, %s833_s22), 1 }
   0xe   : > { %s856_s29 = sshll.u32 %s1277_s22, 8 }
   0xf   : > { %s1030_s8 = scalar_lea.vmem %s1269_s0, %s856_s29  ;;  %887 = vmatpush3.bf16.msra.mxu0 %v956_v2  ;;  %940 = vmatpush3.bf16.msra.mxu1 %v956_v2 }
  0x10   : > { %v253_v4 = vld [vmem:[%s1030_s8] sm:$0xff]  ;;  %v254_v5 = vld [vmem:[%s1030_s8 + $0x8] sm:$0xff]  ;;  %888 = vmatprep.subr.bf16.mxu0 %v957_v3  ;;  %933 = vmatprep.subr.bf16.mxu1 %v957_v3  ;;  %v255_v21 = vld [vmem:[%s1030_s8 + $0x10] sm:$0xff] }
  0x11   : > { %v292_v7 = vmul.f32 %v1040_v6, %v253_v4  ;;  %v293_v8 = vmul.f32 %v1040_v6, %v254_v5  ;;  %v269_v10 = vld [vmem:[%s1030_s8 + $0x80] sm:$0xff]  ;;  %v270_v11 = vld [vmem:[%s1030_s8 + $0x88] sm:$0xff]  ;;  %v256_v24 = vld [vmem:[%s1030_s8 + $0x18] sm:$0xff]  ;;  %v294_v32 = vmul.f32 %v1040_v6, %v255_v21 }
  0x12   : > { %v308_v12 = vmul.f32 %v1040_v6, %v269_v10  ;;  %v309_v13 = vmul.f32 %v1040_v6, %v270_v11  ;;  %v271_v25 = vld [vmem:[%s1030_s8 + $0x90] sm:$0xff]  ;;  %v272_v26 = vld [vmem:[%s1030_s8 + $0x98] sm:$0xff]  ;;  %v257_v28 = vld [vmem:[%s1030_s8 + $0x20] sm:$0xff]  ;;  %v295_v35 = vmul.f32 %v1040_v6, %v256_v24 }
  0x13   : > { %v331_v14 = vadd.f32 %v1047_v9, %v292_v7  ;;  %v332_v15 = vadd.f32 %v1047_v9, %v293_v8  ;;  %889 = vmatpush3.bf16.msra.mxu0 %v957_v3  ;;  %941 = vmatpush3.bf16.msra.mxu1 %v957_v3  ;;  %v258_v29 = vld [vmem:[%s1030_s8 + $0x28] sm:$0xff]  ;;  %v273_v33 = vld [vmem:[%s1030_s8 + $0xa0] sm:$0xff]  ;;  %v310_v36 = vmul.f32 %v1040_v6, %v271_v25  ;;  %v259_v44 = vld [vmem:[%s1030_s8 + $0x30] sm:$0xff] }
  0x14   : > { %v347_v17 = vadd.f32 %v1047_v9, %v308_v12  ;;  %v348_v18 = vadd.f32 %v1047_v9, %v309_v13  ;;  %890 = vmatprep.subr.bf16.mxu0 %v958_v16  ;;  %934 = vmatprep.subr.bf16.mxu1 %v958_v16  ;;  %v274_v34 = vld [vmem:[%s1030_s8 + $0xa8] sm:$0xff]  ;;  %v311_v37 = vmul.f32 %v1040_v6, %v272_v26  ;;  %v260_v48 = vld [vmem:[%s1030_s8 + $0x38] sm:$0xff]  ;;  %v275_v49 = vld [vmem:[%s1030_s8 + $0xb0] sm:$0xff] }
  0x15   : > { %v363_v19 = vmax.f32 %v331_v14, 0.0  ;;  %v364_v20 = vmax.f32 %v332_v15, 0.0  ;;  %v296_v38 = vmul.f32 %v1040_v6, %v257_v28  ;;  %v297_v39 = vmul.f32 %v1040_v6, %v258_v29  ;;  %v276_v50 = vld [vmem:[%s1030_s8 + $0xb8] sm:$0xff]  ;;  %v261_v53 = vld [vmem:[%s1030_s8 + $0x40] sm:$0xff]  ;;  %v262_v57 = vld [vmem:[%s1030_s8 + $0x48] sm:$0xff] }
  0x16   : > { %v379_v22 = vmax.f32 %v347_v17, 0.0  ;;  %v380_v23 = vmax.f32 %v348_v18, 0.0  ;;  %v312_v40 = vmul.f32 %v1040_v6, %v273_v33  ;;  %v313_v41 = vmul.f32 %v1040_v6, %v274_v34  ;;  %v277_v58 = vld [vmem:[%s1030_s8 + $0xc0] sm:$0xff]  ;;  %v278_v59 = vld [vmem:[%s1030_s8 + $0xc8] sm:$0xff]  ;;  %v264_v25 = vld [vmem:[%s1030_s8 + $0x58] sm:$0xff] }
  0x17   : > { %v395_v27 = vpack.c.bf16 %v364_v20, %v363_v19  ;;  %891 = vmatpush3.bf16.msra.mxu0 %v958_v16  ;;  %942 = vmatpush3.bf16.msra.mxu1 %v958_v16  ;;  %v333_v43 = vadd.f32 %v1047_v9, %v294_v32  ;;  %v334_v45 = vadd.f32 %v1047_v9, %v295_v35  ;;  %v263_v20 = vld [vmem:[%s1030_s8 + $0x50] sm:$0xff] }
  0x18   : > { %v403_v31 = vpack.c.bf16 %v380_v23, %v379_v22  ;;  %892 = vmatprep.subr.bf16.mxu0 %v959_v30  ;;  %935 = vmatprep.subr.bf16.mxu1 %v959_v30  ;;  %v349_v46 = vadd.f32 %v1047_v9, %v310_v36  ;;  %v350_v47 = vadd.f32 %v1047_v9, %v311_v37  ;;  %v279_v26 = vld [vmem:[%s1030_s8 + $0xd0] sm:$0xff]  ;;  %v266_v36 = vld [vmem:[%s1030_s8 + $0x68] sm:$0xff]  ;;  %v281_v37 = vld [vmem:[%s1030_s8 + $0xe0] sm:$0xff] }
  0x19   : > { %898 = vmatprep.mubr.bf16.mxu0 %v395_v27  ;;  %v335_v51 = vadd.f32 %v1047_v9, %v296_v38  ;;  %v336_v52 = vadd.f32 %v1047_v9, %v297_v39  ;;  %v351_v54 = vadd.f32 %v1047_v9, %v312_v40  ;;  %v352_v55 = vadd.f32 %v1047_v9, %v313_v41  ;;  %v280_v27 = vld [vmem:[%s1030_s8 + $0xd8] sm:$0xff]  ;;  %v282_v38 = vld [vmem:[%s1030_s8 + $0xe8] sm:$0xff] }
  0x1a   : > { %914 = vmatprep.mubr.bf16.mxu1 %v403_v31  ;;  %v298_v56 = vmul.f32 %v1040_v6, %v259_v44  ;;  %v365_v61 = vmax.f32 %v333_v43, 0.0  ;;  %v299_v62 = vmul.f32 %v1040_v6, %v260_v48  ;;  %v314_v63 = vmul.f32 %v1040_v6, %v275_v49  ;;  %v265_v31 = vld [vmem:[%s1030_s8 + $0x60] sm:$0xff] }
  0x1b   : > { %893 = vmatpush3.bf16.msra.mxu0 %v959_v30  ;;  %943 = vmatpush3.bf16.msra.mxu1 %v959_v30  ;;  %v315_v0 = vmul.f32 %v1040_v6, %v276_v50  ;;  %v366_v1 = vmax.f32 %v334_v45, 0.0  ;;  %v381_v2 = vmax.f32 %v349_v46, 0.0  ;;  %v382_v3 = vmax.f32 %v350_v47, 0.0 }
  0x1c   : > { %894 = vmatprep.subr.bf16.mxu0 %v960_v42  ;;  %936 = vmatprep.subr.bf16.mxu1 %v960_v42  ;;  %v300_v4 = vmul.f32 %v1040_v6, %v261_v53  ;;  %v367_v5 = vmax.f32 %v335_v51, 0.0  ;;  %v301_v7 = vmul.f32 %v1040_v6, %v262_v57  ;;  %v316_v8 = vmul.f32 %v1040_v6, %v277_v58  ;;  %v267_v58 = vld [vmem:[%s1030_s8 + $0x70] sm:$0xff] }
  0x1d   : > { %v317_v10 = vmul.f32 %v1040_v6, %v278_v59  ;;  %v368_v11 = vmax.f32 %v336_v52, 0.0  ;;  %v383_v12 = vmax.f32 %v351_v54, 0.0  ;;  %v384_v13 = vmax.f32 %v352_v55, 0.0 }
  0x1e   : > { %v337_v14 = vadd.f32 %v1047_v9, %v298_v56  ;;  %v338_v15 = vadd.f32 %v1047_v9, %v299_v62  ;;  %v353_v16 = vadd.f32 %v1047_v9, %v314_v63  ;;  %v354_v17 = vadd.f32 %v1047_v9, %v315_v0  ;;  %v268_v63 = vld [vmem:[%s1030_s8 + $0x78] sm:$0xff]  ;;  %v283_v0 = vld [vmem:[%s1030_s8 + $0xf0] sm:$0xff] }
  0x1f   : > { %895 = vmatpush3.bf16.msra.mxu0 %v960_v42  ;;  %944 = vmatpush3.bf16.msra.mxu1 %v960_v42  ;;  %v396_v18 = vpack.c.bf16 %v366_v1, %v365_v61  ;;  %v339_v19 = vadd.f32 %v1047_v9, %v300_v4  ;;  %v404_v21 = vpack.c.bf16 %v382_v3, %v381_v2  ;;  %v284_v1 = vld [vmem:[%s1030_s8 + $0xf8] sm:$0xff]  ;;  %s1176_s8 = scalar_lea.vmem %s1275_s6, %s856_s29 }
  0x20   : > { %896 = vmatprep.subr.bf16.mxu0 %v961_v60  ;;  %937 = vmatprep.subr.bf16.mxu1 %v961_v60  ;;  %v340_v22 = vadd.f32 %v1047_v9, %v301_v7  ;;  %v355_v23 = vadd.f32 %v1047_v9, %v316_v8  ;;  %v356_v24 = vadd.f32 %v1047_v9, %v317_v10  ;;  %v369_v30 = vmax.f32 %v337_v14, 0.0 }
  0x21   : > { %v397_v28 = vpack.c.bf16 %v368_v11, %v367_v5  ;;  %v405_v29 = vpack.c.bf16 %v384_v13, %v383_v12  ;;  %v370_v32 = vmax.f32 %v338_v15, 0.0  ;;  %v385_v33 = vmax.f32 %v353_v16, 0.0 }
  0x22   : > { %v386_v34 = vmax.f32 %v354_v17, 0.0  ;;  %v302_v35 = vmul.f32 %v1040_v6, %v263_v20  ;;  %v371_v39 = vmax.f32 %v339_v19, 0.0  ;;  %v303_v40 = vmul.f32 %v1040_v6, %v264_v25 }
  0x23   : > { %897 = vmatpush3.bf16.msra.mxu0 %v961_v60  ;;  %945 = vmatpush3.bf16.msra.mxu1 %v961_v60  ;;  %v318_v41 = vmul.f32 %v1040_v6, %v279_v26  ;;  %v319_v42 = vmul.f32 %v1040_v6, %v280_v27  ;;  %v372_v43 = vmax.f32 %v340_v22, 0.0  ;;  %v387_v44 = vmax.f32 %v355_v23, 0.0 }
  0x24   : > { %v388_v45 = vmax.f32 %v356_v24, 0.0  ;;  %v304_v46 = vmul.f32 %v1040_v6, %v265_v31  ;;  %v305_v47 = vmul.f32 %v1040_v6, %v266_v36  ;;  %v320_v48 = vmul.f32 %v1040_v6, %v281_v37 }
  0x25   : > { %v321_v49 = vmul.f32 %v1040_v6, %v282_v38  ;;  %v341_v50 = vadd.f32 %v1047_v9, %v302_v35  ;;  %v342_v51 = vadd.f32 %v1047_v9, %v303_v40  ;;  %v357_v52 = vadd.f32 %v1047_v9, %v318_v41 }
  0x26   : > { %899 = vmatmul.mubr.bf16.vlgmr.msra.gmra.mrb[0].mxu0 %v396_v18  ;;  %915 = vmatmul.mubr.bf16.vlgmr.msra.gmra.mrb[0].mxu1 %v404_v21  ;;  %v358_v53 = vadd.f32 %v1047_v9, %v319_v42  ;;  %v398_v54 = vpack.c.bf16 %v370_v32, %v369_v30  ;;  %v406_v55 = vpack.c.bf16 %v386_v34, %v385_v33  ;;  %v1161_v30 = vld [vmem:[%s1274_s5] ss:$0 sm:$0xff] }
  0x27   : > { %902 = vmatprep.mubr.bf16.mxu0 %v397_v28  ;;  %918 = vmatprep.mubr.bf16.mxu1 %v405_v29  ;;  %v399_v56 = vpack.c.bf16 %v372_v43, %v371_v39  ;;  %v407_v57 = vpack.c.bf16 %v388_v45, %v387_v44  ;;  %v343_v59 = vadd.f32 %v1047_v9, %v304_v46  ;;  %v373_v2 = vmax.f32 %v341_v50, 0.0  ;;  %v1156_v29 = vld [vmem:[%s1273_s4] ss:$0 sm:$0xff] }
  0x28   : > { %v344_v60 = vadd.f32 %v1047_v9, %v305_v47  ;;  %v359_v61 = vadd.f32 %v1047_v9, %v320_v48  ;;  %v360_v62 = vadd.f32 %v1047_v9, %v321_v49  ;;  %v374_v3 = vmax.f32 %v342_v51, 0.0 }
  0x29   : > { %v389_v4 = vmax.f32 %v357_v52, 0.0  ;;  %v390_v5 = vmax.f32 %v358_v53, 0.0  ;;  %v306_v7 = vmul.f32 %v1040_v6, %v267_v58  ;;  %v307_v8 = vmul.f32 %v1040_v6, %v268_v63 }
  0x2a   : > { %v322_v10 = vmul.f32 %v1040_v6, %v283_v0  ;;  %v323_v11 = vmul.f32 %v1040_v6, %v284_v1  ;;  %v375_v12 = vmax.f32 %v343_v59, 0.0  ;;  %v376_v13 = vmax.f32 %v344_v60, 0.0 }
  0x2b   : > { %v391_v14 = vmax.f32 %v359_v61, 0.0  ;;  %v392_v15 = vmax.f32 %v360_v62, 0.0  ;;  %v400_v16 = vpack.c.bf16 %v374_v3, %v373_v2  ;;  %v408_v17 = vpack.c.bf16 %v390_v5, %v389_v4 }
  0x2c   : > { %v345_v18 = vadd.f32 %v1047_v9, %v306_v7  ;;  %v346_v19 = vadd.f32 %v1047_v9, %v307_v8  ;;  %v361_v20 = vadd.f32 %v1047_v9, %v322_v10  ;;  %v362_v21 = vadd.f32 %v1047_v9, %v323_v11 }
  0x2d   : > { %v401_v22 = vpack.c.bf16 %v376_v13, %v375_v12  ;;  %v409_v23 = vpack.c.bf16 %v392_v15, %v391_v14 }
  0x2e   : > { %903 = vmatmul.mubr.bf16.gmra.mrb[4].mxu0 %v398_v54  ;;  %919 = vmatmul.mubr.bf16.gmra.mrb[4].mxu1 %v406_v55  ;;  %v377_v6 = vmax.f32 %v345_v18, 0.0  ;;  %v378_v24 = vmax.f32 %v346_v19, 0.0  ;;  %v393_v25 = vmax.f32 %v361_v20, 0.0  ;;  %v394_v26 = vmax.f32 %v362_v21, 0.0 }
  0x2f   : > { %906 = vmatprep.mubr.bf16.mxu0 %v399_v56  ;;  %922 = vmatprep.mubr.bf16.mxu1 %v407_v57 }
  0x30   : > { %v402_v27 = vpack.c.bf16 %v378_v24, %v377_v6  ;;  %v410_v28 = vpack.c.bf16 %v394_v26, %v393_v25 }
  0x36   : > { %907 = vmatmul.mubr.bf16.gmra.mrb[8].mxu0 %v400_v16  ;;  %923 = vmatmul.mubr.bf16.gmra.mrb[8].mxu1 %v408_v17 }
  0x37   : > { %910 = vmatprep.mubr.bf16.mxu0 %v401_v22  ;;  %926 = vmatprep.mubr.bf16.mxu1 %v409_v23 }
  0x3e   : > { %911 = vmatmul.mubr.bf16.gmra.mrb[12].mxu0 %v402_v27  ;;  %927 = vmatmul.mubr.bf16.gmra.mrb[12].mxu1 %v410_v28 }
  0xf9   : > { %v900_v9 = vpop.f32.mrb[0].mxu0  ;;  %v916_v31 = vpop.f32.mrb[0].mxu1 }
  0xfa   : > { %v645_v32 = vmul.f32 %v900_v9, %v1156_v29  ;;  %v661_v33 = vmul.f32 %v916_v31, %v1156_v29  ;;  %v509_v34 = vpop.f32.mrb[1].mxu0  ;;  %v573_v35 = vpop.f32.mrb[1].mxu1 }
  0xfb   : > { %v643_v36 = vmul.f32 %v1156_v29, %v509_v34  ;;  %v659_v37 = vmul.f32 %v1156_v29, %v573_v35  ;;  %v901_v38 = vpop.f32.mrb[2].mxu0  ;;  %v917_v39 = vpop.f32.mrb[2].mxu1 }
  0xfc   : > { %v684_v40 = vadd.f32 %v1161_v30, %v645_v32  ;;  %v700_v41 = vadd.f32 %v1161_v30, %v661_v33  ;;  %v646_v42 = vmul.f32 %v901_v38, %v1156_v29  ;;  %v662_v43 = vmul.f32 %v917_v39, %v1156_v29  ;;  %v512_v44 = vpop.f32.mrb[3].mxu0  ;;  %v576_v45 = vpop.f32.mrb[3].mxu1 }
  0xfd   : > { %v682_v46 = vadd.f32 %v1161_v30, %v643_v36  ;;  %v698_v47 = vadd.f32 %v1161_v30, %v659_v37  ;;  %v644_v48 = vmul.f32 %v1156_v29, %v512_v44  ;;  %v660_v49 = vmul.f32 %v1156_v29, %v576_v45 }
  0xfe   : > { %v716_v50 = vmax.f32 %v684_v40, 0.0  ;;  %v732_v51 = vmax.f32 %v700_v41, 0.0  ;;  %v685_v52 = vadd.f32 %v1161_v30, %v646_v42  ;;  %v701_v53 = vadd.f32 %v1161_v30, %v662_v43 }
  0xff   : > { %v714_v54 = vmax.f32 %v682_v46, 0.0  ;;  %v730_v55 = vmax.f32 %v698_v47, 0.0  ;;  %v683_v56 = vadd.f32 %v1161_v30, %v644_v48  ;;  %v699_v57 = vadd.f32 %v1161_v30, %v660_v49 }
 0x100   : > { %748 = vst [vmem:[%s1176_s8 + $0x10] sm:$0xff] %v716_v50  ;;  %764 = vst [vmem:[%s1176_s8 + $0x90] sm:$0xff] %v732_v51  ;;  %v717_v58 = vmax.f32 %v685_v52, 0.0  ;;  %v733_v59 = vmax.f32 %v701_v53, 0.0 }
 0x101   : > { %746 = vst [vmem:[%s1176_s8] sm:$0xff] %v714_v54  ;;  %762 = vst [vmem:[%s1176_s8 + $0x80] sm:$0xff] %v730_v55  ;;  %v715_v60 = vmax.f32 %v683_v56, 0.0  ;;  %v731_v61 = vmax.f32 %v699_v57, 0.0  ;;  %v904_v62 = vpop.f32.mrb[4].mxu0  ;;  %v920_v63 = vpop.f32.mrb[4].mxu1 }
 0x102   : > { %749 = vst [vmem:[%s1176_s8 + $0x18] sm:$0xff] %v717_v58  ;;  %765 = vst [vmem:[%s1176_s8 + $0x98] sm:$0xff] %v733_v59  ;;  %v649_v0 = vmul.f32 %v904_v62, %v1156_v29  ;;  %v665_v1 = vmul.f32 %v920_v63, %v1156_v29  ;;  %v525_v2 = vpop.f32.mrb[5].mxu0  ;;  %v589_v3 = vpop.f32.mrb[5].mxu1 }
 0x103   : > { %747 = vst [vmem:[%s1176_s8 + $0x8] sm:$0xff] %v715_v60  ;;  %763 = vst [vmem:[%s1176_s8 + $0x88] sm:$0xff] %v731_v61  ;;  %v647_v4 = vmul.f32 %v1156_v29, %v525_v2  ;;  %v663_v5 = vmul.f32 %v1156_v29, %v589_v3  ;;  %v905_v7 = vpop.f32.mrb[6].mxu0  ;;  %v921_v8 = vpop.f32.mrb[6].mxu1 }
 0x104   : > { %v688_v10 = vadd.f32 %v1161_v30, %v649_v0  ;;  %v704_v11 = vadd.f32 %v1161_v30, %v665_v1  ;;  %v650_v12 = vmul.f32 %v905_v7, %v1156_v29  ;;  %v666_v13 = vmul.f32 %v921_v8, %v1156_v29  ;;  %v528_v14 = vpop.f32.mrb[7].mxu0  ;;  %v592_v15 = vpop.f32.mrb[7].mxu1 }
 0x105   : > { %v686_v16 = vadd.f32 %v1161_v30, %v647_v4  ;;  %v702_v17 = vadd.f32 %v1161_v30, %v663_v5  ;;  %v648_v18 = vmul.f32 %v1156_v29, %v528_v14  ;;  %v664_v19 = vmul.f32 %v1156_v29, %v592_v15 }
 0x106   : > { %v720_v20 = vmax.f32 %v688_v10, 0.0  ;;  %v736_v21 = vmax.f32 %v704_v11, 0.0  ;;  %v689_v22 = vadd.f32 %v1161_v30, %v650_v12  ;;  %v705_v23 = vadd.f32 %v1161_v30, %v666_v13 }
 0x107   : > { %v718_v6 = vmax.f32 %v686_v16, 0.0  ;;  %v734_v24 = vmax.f32 %v702_v17, 0.0  ;;  %v687_v25 = vadd.f32 %v1161_v30, %v648_v18  ;;  %v703_v26 = vadd.f32 %v1161_v30, %v664_v19 }
 0x108   : > { %752 = vst [vmem:[%s1176_s8 + $0x30] sm:$0xff] %v720_v20  ;;  %768 = vst [vmem:[%s1176_s8 + $0xb0] sm:$0xff] %v736_v21  ;;  %v721_v27 = vmax.f32 %v689_v22, 0.0  ;;  %v737_v28 = vmax.f32 %v705_v23, 0.0 }
 0x109   : > { %750 = vst [vmem:[%s1176_s8 + $0x20] sm:$0xff] %v718_v6  ;;  %766 = vst [vmem:[%s1176_s8 + $0xa0] sm:$0xff] %v734_v24  ;;  %v719_v9 = vmax.f32 %v687_v25, 0.0  ;;  %v735_v31 = vmax.f32 %v703_v26, 0.0  ;;  %v908_v32 = vpop.f32.mrb[8].mxu0  ;;  %v924_v33 = vpop.f32.mrb[8].mxu1 }
 0x10a   : > { %753 = vst [vmem:[%s1176_s8 + $0x38] sm:$0xff] %v721_v27  ;;  %769 = vst [vmem:[%s1176_s8 + $0xb8] sm:$0xff] %v737_v28  ;;  %v653_v34 = vmul.f32 %v908_v32, %v1156_v29  ;;  %v669_v35 = vmul.f32 %v924_v33, %v1156_v29  ;;  %v541_v36 = vpop.f32.mrb[9].mxu0  ;;  %v605_v37 = vpop.f32.mrb[9].mxu1 }
 0x10b   : > { %751 = vst [vmem:[%s1176_s8 + $0x28] sm:$0xff] %v719_v9  ;;  %767 = vst [vmem:[%s1176_s8 + $0xa8] sm:$0xff] %v735_v31  ;;  %v651_v38 = vmul.f32 %v1156_v29, %v541_v36  ;;  %v667_v39 = vmul.f32 %v1156_v29, %v605_v37  ;;  %v909_v40 = vpop.f32.mrb[10].mxu0  ;;  %v925_v41 = vpop.f32.mrb[10].mxu1 }
 0x10c   : > { %v692_v42 = vadd.f32 %v1161_v30, %v653_v34  ;;  %v708_v43 = vadd.f32 %v1161_v30, %v669_v35  ;;  %v654_v44 = vmul.f32 %v909_v40, %v1156_v29  ;;  %v670_v45 = vmul.f32 %v925_v41, %v1156_v29  ;;  %v544_v46 = vpop.f32.mrb[11].mxu0  ;;  %v608_v47 = vpop.f32.mrb[11].mxu1 }
 0x10d   : > { %v690_v48 = vadd.f32 %v1161_v30, %v651_v38  ;;  %v706_v49 = vadd.f32 %v1161_v30, %v667_v39  ;;  %v652_v50 = vmul.f32 %v1156_v29, %v544_v46  ;;  %v668_v51 = vmul.f32 %v1156_v29, %v608_v47 }
 0x10e   : > { %v724_v52 = vmax.f32 %v692_v42, 0.0  ;;  %v740_v53 = vmax.f32 %v708_v43, 0.0  ;;  %v693_v54 = vadd.f32 %v1161_v30, %v654_v44  ;;  %v709_v55 = vadd.f32 %v1161_v30, %v670_v45 }
 0x10f   : > { %v722_v56 = vmax.f32 %v690_v48, 0.0  ;;  %v738_v57 = vmax.f32 %v706_v49, 0.0  ;;  %v691_v58 = vadd.f32 %v1161_v30, %v652_v50  ;;  %v707_v59 = vadd.f32 %v1161_v30, %v668_v51 }
 0x110   : > { %756 = vst [vmem:[%s1176_s8 + $0x50] sm:$0xff] %v724_v52  ;;  %772 = vst [vmem:[%s1176_s8 + $0xd0] sm:$0xff] %v740_v53  ;;  %v725_v60 = vmax.f32 %v693_v54, 0.0  ;;  %v741_v61 = vmax.f32 %v709_v55, 0.0 }
 0x111   : > { %754 = vst [vmem:[%s1176_s8 + $0x40] sm:$0xff] %v722_v56  ;;  %770 = vst [vmem:[%s1176_s8 + $0xc0] sm:$0xff] %v738_v57  ;;  %v723_v62 = vmax.f32 %v691_v58, 0.0  ;;  %v739_v63 = vmax.f32 %v707_v59, 0.0  ;;  %v912_v0 = vpop.f32.mrb[12].mxu0  ;;  %v928_v1 = vpop.f32.mrb[12].mxu1 }
 0x112   : > { %757 = vst [vmem:[%s1176_s8 + $0x58] sm:$0xff] %v725_v60  ;;  %773 = vst [vmem:[%s1176_s8 + $0xd8] sm:$0xff] %v741_v61  ;;  %v657_v2 = vmul.f32 %v912_v0, %v1156_v29  ;;  %v673_v3 = vmul.f32 %v928_v1, %v1156_v29  ;;  %v557_v4 = vpop.f32.mrb[13].mxu0  ;;  %v621_v5 = vpop.f32.mrb[13].mxu1 }
 0x113   : > { %755 = vst [vmem:[%s1176_s8 + $0x48] sm:$0xff] %v723_v62  ;;  %771 = vst [vmem:[%s1176_s8 + $0xc8] sm:$0xff] %v739_v63  ;;  %v655_v7 = vmul.f32 %v1156_v29, %v557_v4  ;;  %v671_v8 = vmul.f32 %v1156_v29, %v621_v5  ;;  %v913_v10 = vpop.f32.mrb[14].mxu0  ;;  %v929_v11 = vpop.f32.mrb[14].mxu1 }
 0x114   : > { %v696_v12 = vadd.f32 %v1161_v30, %v657_v2  ;;  %v712_v13 = vadd.f32 %v1161_v30, %v673_v3  ;;  %v658_v14 = vmul.f32 %v913_v10, %v1156_v29  ;;  %v674_v15 = vmul.f32 %v929_v11, %v1156_v29  ;;  %v560_v16 = vpop.f32.mrb[15].mxu0  ;;  %v624_v17 = vpop.f32.mrb[15].mxu1 }
 0x115   : > { %v694_v18 = vadd.f32 %v1161_v30, %v655_v7  ;;  %v710_v19 = vadd.f32 %v1161_v30, %v671_v8  ;;  %v656_v20 = vmul.f32 %v1156_v29, %v560_v16  ;;  %v672_v21 = vmul.f32 %v1156_v29, %v624_v17 }
 0x116   : > { %v728_v22 = vmax.f32 %v696_v12, 0.0  ;;  %v744_v23 = vmax.f32 %v712_v13, 0.0  ;;  %v697_v6 = vadd.f32 %v1161_v30, %v658_v14  ;;  %v713_v24 = vadd.f32 %v1161_v30, %v674_v15 }
 0x117   : > { %v726_v25 = vmax.f32 %v694_v18, 0.0  ;;  %v742_v26 = vmax.f32 %v710_v19, 0.0  ;;  %v695_v27 = vadd.f32 %v1161_v30, %v656_v20  ;;  %v711_v28 = vadd.f32 %v1161_v30, %v672_v21 }
 0x118   : > { %760 = vst [vmem:[%s1176_s8 + $0x70] sm:$0xff] %v728_v22  ;;  %776 = vst [vmem:[%s1176_s8 + $0xf0] sm:$0xff] %v744_v23  ;;  %v729_v9 = vmax.f32 %v697_v6, 0.0  ;;  %v745_v29 = vmax.f32 %v713_v24, 0.0 }
 0x119   : > { %758 = vst [vmem:[%s1176_s8 + $0x60] sm:$0xff] %v726_v25  ;;  %774 = vst [vmem:[%s1176_s8 + $0xe0] sm:$0xff] %v742_v26  ;;  %v727_v31 = vmax.f32 %v695_v27, 0.0  ;;  %v743_v32 = vmax.f32 %v711_v28, 0.0 }
 0x11a   : > { %761 = vst [vmem:[%s1176_s8 + $0x78] sm:$0xff] %v729_v9  ;;  %777 = vst [vmem:[%s1176_s8 + $0xf8] sm:$0xff] %v745_v29 }
 0x11b   : > { %759 = vst [vmem:[%s1176_s8 + $0x68] sm:$0xff] %v727_v31  ;;  %775 = vst [vmem:[%s1176_s8 + $0xe8] sm:$0xff] %v743_v32 }
 0x11c PF: > { %s16_s21 = sadd.s32 1, %s968_s21  }
 0x11d   : > { %p13_p4 = scmp.ge.s32.totalorder %s16_s21, 4  }
 0x11f   :  { %15 = sbr.rel (!%p13_p4) target bundleno = 1 (0x1), region = 74 }

// kernel: dense_block_eca_forward.13
= control target key start
LH: loop header
LB: loop body
LE: loop exit
PB: predicated region body
PF: predicated region fallthrough
CT: control target
= control target key end

     0   :  { %s560_s9 = smov 0   ;;  %s836_s0 = inlined_call_operand.vmem [shape: f32[2,16,16,128], index: 0, kind: input, shape index: {}]   ;;  %s837_s1 = inlined_call_operand.vmem [shape: f32[128,128], index: 1, kind: input, shape index: {}]   ;;  %s838_s2 = inlined_call_operand.vmem [shape: f32[2,16,16,128], index: 2, kind: output, shape index: {}]  }
   0x1 LB: > { %s430_s10 = sadd.s32 4294967295, %s540_s9   ;;  %p434_p0 = scmp.ge.s32.totalorder %s540_s9, 1  ;;  %s540_s9 = sphi %s560_s9, %s12_s9  }
   0x2   : > { %p112_p1 = scmp.lt.s32.totalorder %s540_s9, 3 }
   0x4   : > { %p113_p2 = pnand %p434_p0, %p112_p1 }
   0x5   : > { %v215_v0 = vld [vmem:[%s837_s1] sm:$0xff] (!%p113_p2)  ;;  %v216_v1 = vld [vmem:[%s837_s1 + $0x8] sm:$0xff] (!%p113_p2)  ;;  %v217_v2 = vld [vmem:[%s837_s1 + $0x10] sm:$0xff] (!%p113_p2)  ;;  %v542_v3 = vmov (!%p113_p2), 0.0|0.0   ;;  %vm543_vm0 = vmmov (!%p113_p2), 0   ;;  %v544_v6 = vmov (!%p113_p2), 0.0  }
   0x6   : > { %116 = sbr.rel (%p113_p2) target bundleno = 354 (0x162), region = 28  ;;  %495 = vmatprep.subr.bf16.mxu0 (!%p113_p2), %v542_v3  ;;  %v496_v4 = vpack.c.bf16 (!%p113_p2), %v216_v1, %v215_v0  ;;  %v218_v5 = vld [vmem:[%s837_s1 + $0x18] sm:$0xff] (!%p113_p2)  ;;  %492 = vmatprep.mubr.msk.f32.mxu0 (!%p113_p2), %vm543_vm0, %v544_v6  ;;  %p134_p3 = scmp.lt.s32.totalorder (!%p113_p2), %s430_s10, 1  ;;  %v219_v8 = vld [vmem:[%s837_s1 + $0x20] sm:$0xff] (!%p113_p2)  ;;  %v220_v9 = vld [vmem:[%s837_s1 + $0x28] sm:$0xff] (!%p113_p2) }
   0x7   : > { %v499_v7 = vpack.c.bf16 (!%p113_p2), %v218_v5, %v217_v2  ;;  %v502_v10 = vpack.c.bf16 (!%p113_p2), %v220_v9, %v219_v8  ;;  %v221_v14 = vld [vmem:[%s837_s1 + $0x30] sm:$0xff] (!%p113_p2)  ;;  %v222_v15 = vld [vmem:[%s837_s1 + $0x38] sm:$0xff] (!%p113_p2)  ;;  %v223_v21 = vld [vmem:[%s837_s1 + $0x40] sm:$0xff] (!%p113_p2) }
   0x8   : > { %497 = vmatpush3.bf16.msra.mxu0 (!%p113_p2), %v496_v4  ;;  %v505_v19 = vpack.c.bf16 (!%p113_p2), %v222_v15, %v221_v14  ;;  %v224_v22 = vld [vmem:[%s837_s1 + $0x48] sm:$0xff] (!%p113_p2)  ;;  %v225_v28 = vld [vmem:[%s837_s1 + $0x50] sm:$0xff] (!%p113_p2)  ;;  %v226_v29 = vld [vmem:[%s837_s1 + $0x58] sm:$0xff] (!%p113_p2) }
   0x9   : > { %498 = vmatprep.subr.bf16.mxu0 (!%p113_p2), %v542_v3  ;;  %v508_v26 = vpack.c.bf16 (!%p113_p2), %v224_v22, %v223_v21  ;;  %v511_v33 = vpack.c.bf16 (!%p113_p2), %v226_v29, %v225_v28  ;;  %v227_v35 = vld [vmem:[%s837_s1 + $0x60] sm:$0xff] (!%p113_p2)  ;;  %v228_v36 = vld [vmem:[%s837_s1 + $0x68] sm:$0xff] (!%p113_p2)  ;;  %v229_v42 = vld [vmem:[%s837_s1 + $0x70] sm:$0xff] (!%p113_p2) }
   0xa   : > { %v514_v40 = vpack.c.bf16 (!%p113_p2), %v228_v36, %v227_v35  ;;  %v230_v43 = vld [vmem:[%s837_s1 + $0x78] sm:$0xff] (!%p113_p2) }
   0xb   : > { %v517_v47 = vpack.c.bf16 (!%p113_p2), %v230_v43, %v229_v42 }
   0xc   : > { %500 = vmatpush3.bf16.msra.mxu0 (!%p113_p2), %v499_v7 }
   0xd   : > { %s840_s10 = smov (!%p134_p3, %s430_s10), 1  ;;  %501 = vmatprep.subr.bf16.mxu0 %v542_v3 }
   0xe   : > { %s441_s23 = sshll.u32 %s840_s10, 8 }
   0xf   : > { %s596_s26 = scalar_lea.vmem %s836_s0, %s441_s23  ;;  %s767_s24 = scalar_lea.vmem %s838_s2, %s441_s23 }
  0x10   : > { %v599_v11 = vld [vmem:[%s596_s26] sm:$0xff]  ;;  %v602_v12 = vld [vmem:[%s596_s26 + $0x8] sm:$0xff]  ;;  %v605_v13 = vld [vmem:[%s596_s26 + $0x10] sm:$0xff]  ;;  %503 = vmatpush3.bf16.msra.mxu0 %v502_v10 }
  0x11   : > { %v176_v16 = vadd.f32 %v602_v12, %v599_v11  ;;  %v617_v17 = vld [vmem:[%s596_s26 + $0x18] sm:$0xff]  ;;  %v621_v20 = vld [vmem:[%s596_s26 + $0x20] sm:$0xff]  ;;  %504 = vmatprep.subr.bf16.mxu0 %v542_v3  ;;  %v632_v24 = vld [vmem:[%s596_s26 + $0x28] sm:$0xff] }
  0x12   : > { %v636_v27 = vld [vmem:[%s596_s26 + $0x30] sm:$0xff]  ;;  %v647_v31 = vld [vmem:[%s596_s26 + $0x38] sm:$0xff]  ;;  %v651_v34 = vld [vmem:[%s596_s26 + $0x40] sm:$0xff] }
  0x13   : > { %v177_v18 = vadd.f32 %v176_v16, %v605_v13  ;;  %v662_v38 = vld [vmem:[%s596_s26 + $0x48] sm:$0xff]  ;;  %v666_v41 = vld [vmem:[%s596_s26 + $0x50] sm:$0xff]  ;;  %v677_v45 = vld [vmem:[%s596_s26 + $0x58] sm:$0xff] }
  0x14   : > { %506 = vmatpush3.bf16.msra.mxu0 %v505_v19  ;;  %v681_v48 = vld [vmem:[%s596_s26 + $0x60] sm:$0xff]  ;;  %v686_v50 = vld [vmem:[%s596_s26 + $0x68] sm:$0xff]  ;;  %v690_v52 = vld [vmem:[%s596_s26 + $0x70] sm:$0xff] }
  0x15   : > { %v178_v23 = vadd.f32 %v177_v18, %v617_v17  ;;  %507 = vmatprep.subr.bf16.mxu0 %v542_v3  ;;  %v694_v54 = vld [vmem:[%s596_s26 + $0x78] sm:$0xff]  ;;  %v698_v56 = vld [vmem:[%s596_s26 + $0x80] sm:$0xff]  ;;  %v702_v58 = vld [vmem:[%s596_s26 + $0x88] sm:$0xff] }
  0x16   : > { %v706_v60 = vld [vmem:[%s596_s26 + $0x90] sm:$0xff]  ;;  %v710_v62 = vld [vmem:[%s596_s26 + $0x98] sm:$0xff]  ;;  %v714_v0 = vld [vmem:[%s596_s26 + $0xa0] sm:$0xff] }
  0x17   : > { %v179_v25 = vadd.f32 %v178_v23, %v621_v20  ;;  %v718_v2 = vld [vmem:[%s596_s26 + $0xa8] sm:$0xff]  ;;  %v722_v4 = vld [vmem:[%s596_s26 + $0xb0] sm:$0xff]  ;;  %v726_v6 = vld [vmem:[%s596_s26 + $0xb8] sm:$0xff] }
  0x18   : > { %509 = vmatpush3.bf16.msra.mxu0 %v508_v26  ;;  %v730_v8 = vld [vmem:[%s596_s26 + $0xc0] sm:$0xff]  ;;  %v734_v10 = vld [vmem:[%s596_s26 + $0xc8] sm:$0xff]  ;;  %v738_v15 = vld [vmem:[%s596_s26 + $0xd0] sm:$0xff] }
  0x19   : > { %v180_v30 = vadd.f32 %v179_v25, %v632_v24  ;;  %510 = vmatprep.subr.bf16.mxu0 %v542_v3  ;;  %v742_v18 = vld [vmem:[%s596_s26 + $0xd8] sm:$0xff]  ;;  %v746_v21 = vld [vmem:[%s596_s26 + $0xe0] sm:$0xff]  ;;  %v750_v23 = vld [vmem:[%s596_s26 + $0xe8] sm:$0xff] }
  0x1a   : > { %v754_v26 = vld [vmem:[%s596_s26 + $0xf0] sm:$0xff]  ;;  %v758_v29 = vld [vmem:[%s596_s26 + $0xf8] sm:$0xff] }
  0x1b   : > { %v181_v32 = vadd.f32 %v180_v30, %v636_v27 }
  0x1c   : > { %512 = vmatpush3.bf16.msra.mxu0 %v511_v33 }
  0x1d   : > { %v182_v37 = vadd.f32 %v181_v32, %v647_v31  ;;  %513 = vmatprep.subr.bf16.mxu0 %v542_v3 }
  0x1f   : > { %v183_v39 = vadd.f32 %v182_v37, %v651_v34 }
  0x20   : > { %515 = vmatpush3.bf16.msra.mxu0 %v514_v40 }
  0x21   : > { %v184_v44 = vadd.f32 %v183_v39, %v662_v38  ;;  %516 = vmatprep.subr.bf16.mxu0 %v542_v3 }
  0x23   : > { %v185_v46 = vadd.f32 %v184_v44, %v666_v41 }
  0x24   : > { %518 = vmatpush3.bf16.msra.mxu0 %v517_v47 }
  0x25   : > { %v186_v49 = vadd.f32 %v185_v46, %v677_v45 }
  0x27   : > { %v187_v51 = vadd.f32 %v186_v49, %v681_v48 }
  0x29   : > { %v188_v53 = vadd.f32 %v187_v51, %v686_v50 }
  0x2b   : > { %v189_v55 = vadd.f32 %v188_v53, %v690_v52  ;;  %v307_v53 = vlaneseq }
  0x2d   : > { %v190_v57 = vadd.f32 %v189_v55, %v694_v54  ;;  %v308_v55 = vshrl.u32 %v307_v53, 7 }
  0x2f   : > { %v191_v59 = vadd.f32 %v190_v57, %v698_v56  ;;  %v309_v57 = vsub.s32 0, %v308_v55 }
  0x31   : > { %v192_v61 = vadd.f32 %v191_v59, %v702_v58 }
  0x33   : > { %v193_v63 = vadd.f32 %v192_v61, %v706_v60 }
  0x35   : > { %v194_v1 = vadd.f32 %v193_v63, %v710_v62 }
  0x37   : > { %v195_v3 = vadd.f32 %v194_v1, %v714_v0 }
  0x39   : > { %v196_v5 = vadd.f32 %v195_v3, %v718_v2 }
  0x3b   : > { %v197_v7 = vadd.f32 %v196_v5, %v722_v4 }
  0x3d   : > { %v198_v9 = vadd.f32 %v197_v7, %v726_v6 }
  0x3f   : > { %v199_v14 = vadd.f32 %v198_v9, %v730_v8 }
  0x41   : > { %v200_v16 = vadd.f32 %v199_v14, %v734_v10 }
  0x43   : > { %v201_v19 = vadd.f32 %v200_v16, %v738_v15 }
  0x45   : > { %v202_v22 = vadd.f32 %v201_v19, %v742_v18 }
  0x47   : > { %v203_v25 = vadd.f32 %v202_v22, %v746_v21 }
  0x49   : > { %v204_v28 = vadd.f32 %v203_v25, %v750_v23 }
  0x4b   : > { %v205_v30 = vadd.f32 %v204_v28, %v754_v26 }
  0x4d   : > { %v206_v32 = vadd.f32 %v205_v30, %v758_v29 }
  0x4f   : > { %v207_v33 = vrot.slane %v206_v32, 4 }
  0x51   : > { %v208_v35 = vadd.f32 %v207_v33, %v206_v32 }
  0x53   : > { %v209_v36 = vrot.slane %v208_v35, 2 }
  0x55   : > { %v210_v37 = vadd.f32 %v209_v36, %v208_v35 }
  0x57   : > { %v211_v39 = vrot.slane %v210_v37, 1 }
  0x59   : > { %v212_v40 = vadd.f32 %v211_v39, %v210_v37 }
  0x5b   : > { %v214_v42 = vmul.f32 0.00390625, %v212_v40 }
  0x5d   : > { %493 = vmatmul.mubr.f32.vlgmr.msra.gmra.mrb[0].mxu0 %v214_v42 }
 0x130   : > { %v297_v43 = vpop.f32.mrb[0].mxu0 }
 0x131   : > { %v301_v44 = vsub.f32 0.0, %v297_v43  ;;  %v494_v46 = vpop.f32.mrb[1].mxu0 }
 0x133   : > { %v302_v47 = vmul.f32 1.442695, %v301_v44 }
 0x135   : > { %530 = vpow2.f32 %v302_v47 }
 0x13f   : > { %v531_v49 = vpop.eup %530 }
 0x140   : > { %v304_v51 = vadd.f32 1.0, %v531_v49 }
 0x142   : > { %532 = vrcp.f32 %v304_v51 }
 0x14c   : > { %v533_v59 = vpop.eup %532 }
 0x14d   : > { %v310_v61 = vrot.slane %v533_v59, %v309_v57 }
 0x14f   : > { %v311_v63 = vmul.f32 %v310_v61, %v599_v11  ;;  %v312_v1 = vmul.f32 %v310_v61, %v602_v12  ;;  %v313_v3 = vmul.f32 %v310_v61, %v605_v13  ;;  %v314_v5 = vmul.f32 %v310_v61, %v617_v17 }
 0x150   : > { %v315_v7 = vmul.f32 %v310_v61, %v621_v20  ;;  %v316_v9 = vmul.f32 %v310_v61, %v632_v24  ;;  %v317_v14 = vmul.f32 %v310_v61, %v636_v27  ;;  %v318_v16 = vmul.f32 %v310_v61, %v647_v31 }
 0x151   : > { %v319_v11 = vmul.f32 %v310_v61, %v651_v34  ;;  %v320_v12 = vmul.f32 %v310_v61, %v662_v38  ;;  %v321_v13 = vmul.f32 %v310_v61, %v666_v41  ;;  %v322_v17 = vmul.f32 %v310_v61, %v677_v45  ;;  %343 = vst [vmem:[%s767_s24] sm:$0xff] %v311_v63 }
 0x152   : > { %344 = vst [vmem:[%s767_s24 + $0x8] sm:$0xff] %v312_v1  ;;  %345 = vst [vmem:[%s767_s24 + $0x10] sm:$0xff] %v313_v3  ;;  %v323_v20 = vmul.f32 %v310_v61, %v681_v48  ;;  %v324_v24 = vmul.f32 %v310_v61, %v686_v50  ;;  %v325_v27 = vmul.f32 %v310_v61, %v690_v52 }
 0x153   : > { %346 = vst [vmem:[%s767_s24 + $0x18] sm:$0xff] %v314_v5  ;;  %v326_v31 = vmul.f32 %v310_v61, %v694_v54  ;;  %347 = vst [vmem:[%s767_s24 + $0x20] sm:$0xff] %v315_v7  ;;  %v327_v34 = vmul.f32 %v310_v61, %v698_v56  ;;  %v328_v38 = vmul.f32 %v310_v61, %v702_v58 }
 0x154   : > { %348 = vst [vmem:[%s767_s24 + $0x28] sm:$0xff] %v316_v9  ;;  %349 = vst [vmem:[%s767_s24 + $0x30] sm:$0xff] %v317_v14  ;;  %v329_v41 = vmul.f32 %v310_v61, %v706_v60  ;;  %v330_v45 = vmul.f32 %v310_v61, %v710_v62  ;;  %v331_v48 = vmul.f32 %v310_v61, %v714_v0 }
 0x155   : > { %350 = vst [vmem:[%s767_s24 + $0x38] sm:$0xff] %v318_v16  ;;  %351 = vst [vmem:[%s767_s24 + $0x40] sm:$0xff] %v319_v11  ;;  %v332_v50 = vmul.f32 %v310_v61, %v718_v2  ;;  %v333_v52 = vmul.f32 %v310_v61, %v722_v4  ;;  %v334_v54 = vmul.f32 %v310_v61, %v726_v6 }
 0x156   : > { %352 = vst [vmem:[%s767_s24 + $0x48] sm:$0xff] %v320_v12  ;;  %353 = vst [vmem:[%s767_s24 + $0x50] sm:$0xff] %v321_v13  ;;  %v335_v56 = vmul.f32 %v310_v61, %v730_v8  ;;  %v336_v58 = vmul.f32 %v310_v61, %v734_v10  ;;  %v337_v60 = vmul.f32 %v310_v61, %v738_v15 }
 0x157   : > { %354 = vst [vmem:[%s767_s24 + $0x58] sm:$0xff] %v322_v17  ;;  %355 = vst [vmem:[%s767_s24 + $0x60] sm:$0xff] %v323_v20  ;;  %v338_v62 = vmul.f32 %v310_v61, %v742_v18  ;;  %v339_v0 = vmul.f32 %v310_v61, %v746_v21  ;;  %v340_v2 = vmul.f32 %v310_v61, %v750_v23 }
 0x158   : > { %356 = vst [vmem:[%s767_s24 + $0x68] sm:$0xff] %v324_v24  ;;  %357 = vst [vmem:[%s767_s24 + $0x70] sm:$0xff] %v325_v27  ;;  %v341_v4 = vmul.f32 %v310_v61, %v754_v26  ;;  %v342_v6 = vmul.f32 %v310_v61, %v758_v29 }
 0x159   : > { %358 = vst [vmem:[%s767_s24 + $0x78] sm:$0xff] %v326_v31  ;;  %359 = vst [vmem:[%s767_s24 + $0x80] sm:$0xff] %v327_v34 }
 0x15a   : > { %360 = vst [vmem:[%s767_s24 + $0x88] sm:$0xff] %v328_v38  ;;  %361 = vst [vmem:[%s767_s24 + $0x90] sm:$0xff] %v329_v41 }
 0x15b   : > { %362 = vst [vmem:[%s767_s24 + $0x98] sm:$0xff] %v330_v45  ;;  %363 = vst [vmem:[%s767_s24 + $0xa0] sm:$0xff] %v331_v48 }
 0x15c   : > { %364 = vst [vmem:[%s767_s24 + $0xa8] sm:$0xff] %v332_v50  ;;  %365 = vst [vmem:[%s767_s24 + $0xb0] sm:$0xff] %v333_v52 }
 0x15d   : > { %366 = vst [vmem:[%s767_s24 + $0xb8] sm:$0xff] %v334_v54  ;;  %367 = vst [vmem:[%s767_s24 + $0xc0] sm:$0xff] %v335_v56 }
 0x15e   : > { %368 = vst [vmem:[%s767_s24 + $0xc8] sm:$0xff] %v336_v58  ;;  %369 = vst [vmem:[%s767_s24 + $0xd0] sm:$0xff] %v337_v60 }
 0x15f   : > { %370 = vst [vmem:[%s767_s24 + $0xd8] sm:$0xff] %v338_v62  ;;  %371 = vst [vmem:[%s767_s24 + $0xe0] sm:$0xff] %v339_v0 }
 0x160   : > { %372 = vst [vmem:[%s767_s24 + $0xe8] sm:$0xff] %v340_v2  ;;  %373 = vst [vmem:[%s767_s24 + $0xf0] sm:$0xff] %v341_v4 }
 0x161   : > { %374 = vst [vmem:[%s767_s24 + $0xf8] sm:$0xff] %v342_v6 }
 0x162 PF: > { %s12_s9 = sadd.s32 1, %s540_s9  }
 0x163   : > { %p9_p4 = scmp.ge.s32.totalorder %s12_s9, 4  }
 0x165   :  { %11 = sbr.rel (!%p9_p4) target bundleno = 1 (0x1), region = 58 }

// kernel: dense_block_eca_forward.8
= control target key start
LH: loop header
LB: loop body
LE: loop exit
PB: predicated region body
PF: predicated region fallthrough
CT: control target
= control target key end

     0   :  { %s4489_s12 = smov 0   ;;  %s5283_s0 = inlined_call_operand.vmem [shape: f32[2,18,18,128], index: 0, kind: input, shape index: {}]   ;;  %s5284_s1 = inlined_call_operand.vmem [shape: bf16[9,128,128], index: 1, kind: input, shape index: {}]   ;;  %s5285_s2 = inlined_call_operand.vmem [shape: f32[2,16,16,128], index: 2, kind: input, shape index: {}, may-alias: {2,3}]   ;;  %s5286_s3 = inlined_call_operand.vmem [shape: f32[2,16,16,128], index: 3, kind: output, shape index: {}, may-alias: {2,3}]  }
   0x1 LB: > { %s3046_s13 = sadd.s32 4294967295, %s4467_s12   ;;  %p3050_p0 = scmp.ge.s32.totalorder %s4467_s12, 1  ;;  %s4467_s12 = sphi %s4489_s12, %s13_s12  }
   0x2   : > { %p147_p1 = scmp.lt.s32.totalorder %s4467_s12, 3 }
   0x4   : > { %p148_p2 = pnand %p3050_p0, %p147_p1 }
   0x5   : > { %v4381_v0 = vld [vmem:[%s5284_s1 + $0x40] sm:$0xff] (!%p148_p2)   ;;  %p176_p3 = scmp.lt.s32.totalorder (!%p148_p2), %s3046_s13, 1  ;;  %v4383_v2 = vld [vmem:[%s5284_s1 + $0x48] sm:$0xff] (!%p148_p2)   ;;  %v4385_v4 = vld [vmem:[%s5284_s1 + $0x50] sm:$0xff] (!%p148_p2)  }
   0x6   : > { %151 = sbr.rel (%p148_p2) target bundleno = 539 (0x21b), region = 32  ;;  %v4382_v1 = vld [vmem:[%s5284_s1 + $0x100] sm:$0xff] (!%p148_p2)   ;;  %3668 = vmatprep.subr.bf16.mxu1 (!%p148_p2), %v4381_v0  ;;  %v4384_v3 = vld [vmem:[%s5284_s1 + $0x108] sm:$0xff] (!%p148_p2)   ;;  %v4386_v5 = vld [vmem:[%s5284_s1 + $0x110] sm:$0xff] (!%p148_p2)  }
   0x7   : > { %3860 = vmatprep.subr.bf16.mxu0 (!%p148_p2), %v4382_v1  ;;  %3669 = vmatpush3.bf16.msra.mxu1 (!%p148_p2), %v4381_v0  ;;  %v4387_v6 = vld [vmem:[%s5284_s1 + $0x58] sm:$0xff] (!%p148_p2)   ;;  %v4389_v8 = vld [vmem:[%s5284_s1 + $0x60] sm:$0xff] (!%p148_p2)   ;;  %v4391_v10 = vld [vmem:[%s5284_s1 + $0x68] sm:$0xff] (!%p148_p2)  }
   0x8   : > { %3861 = vmatpush3.bf16.msra.mxu0 (!%p148_p2), %v4382_v1  ;;  %3670 = vmatprep.subr.bf16.mxu1 (!%p148_p2), %v4383_v2  ;;  %v4388_v7 = vld [vmem:[%s5284_s1 + $0x118] sm:$0xff] (!%p148_p2)   ;;  %v4390_v9 = vld [vmem:[%s5284_s1 + $0x120] sm:$0xff] (!%p148_p2)   ;;  %v4392_v11 = vld [vmem:[%s5284_s1 + $0x128] sm:$0xff] (!%p148_p2)  }
   0x9   : > { %3862 = vmatprep.subr.bf16.mxu0 (!%p148_p2), %v4384_v3  ;;  %v4393_v18 = vld [vmem:[%s5284_s1 + $0x70] sm:$0xff] (!%p148_p2)   ;;  %v4395_v20 = vld [vmem:[%s5284_s1 + $0x78] sm:$0xff] (!%p148_p2)   ;;  %v4397_v22 = vld [vmem:[%s5284_s1] sm:$0xff] (!%p148_p2)  }
   0xa   : > { %v4394_v19 = vld [vmem:[%s5284_s1 + $0x130] sm:$0xff] (!%p148_p2)   ;;  %v4396_v21 = vld [vmem:[%s5284_s1 + $0x138] sm:$0xff] (!%p148_p2)   ;;  %v4398_v25 = vld [vmem:[%s5284_s1 + $0x140] sm:$0xff] (!%p148_p2)  }
   0xb   : > { %3671 = vmatpush3.bf16.msra.mxu1 (!%p148_p2), %v4383_v2  ;;  %v4399_v29 = vld [vmem:[%s5284_s1 + $0x148] sm:$0xff] (!%p148_p2)   ;;  %v4401_v34 = vld [vmem:[%s5284_s1 + $0x150] sm:$0xff] (!%p148_p2)   ;;  %v4402_v40 = vld [vmem:[%s5284_s1 + $0x158] sm:$0xff] (!%p148_p2)  }
   0xc   : > { %3863 = vmatpush3.bf16.msra.mxu0 (!%p148_p2), %v4384_v3  ;;  %3672 = vmatprep.subr.bf16.mxu1 (!%p148_p2), %v4385_v4  ;;  %v4400_v31 = vld [vmem:[%s5284_s1 + $0x8] sm:$0xff] (!%p148_p2)   ;;  %v4403_v36 = vld [vmem:[%s5284_s1 + $0x10] sm:$0xff] (!%p148_p2)   ;;  %v4406_v41 = vld [vmem:[%s5284_s1 + $0x18] sm:$0xff] (!%p148_p2)  }
   0xd   : > { %s5288_s13 = smov (!%p176_p3, %s3046_s13), 1  ;;  %3864 = vmatprep.subr.bf16.mxu0 %v4386_v5  ;;  %v4404_v44 = vld [vmem:[%s5284_s1 + $0x160] sm:$0xff]   ;;  %v4405_v50 = vld [vmem:[%s5284_s1 + $0x168] sm:$0xff]   ;;  %v4407_v54 = vld [vmem:[%s5284_s1 + $0x170] sm:$0xff]  }
   0xe   : > { %s4372_s30 = smul.u32 432, %s5288_s13  ;;  %v4409_v47 = vld [vmem:[%s5284_s1 + $0x20] sm:$0xff]   ;;  %v4411_v51 = vld [vmem:[%s5284_s1 + $0x28] sm:$0xff]   ;;  %v4413_v57 = vld [vmem:[%s5284_s1 + $0x30] sm:$0xff]  }
   0xf   : > { %3673 = vmatpush3.bf16.msra.mxu1 %v4385_v4  ;;  %v4408_v60 = vld [vmem:[%s5284_s1 + $0x178] sm:$0xff]   ;;  %v4410_v4 = vld [vmem:[%s5284_s1 + $0x180] sm:$0xff]  }
  0x10   : > { %3865 = vmatpush3.bf16.msra.mxu0 %v4386_v5  ;;  %3674 = vmatprep.subr.bf16.mxu1 %v4387_v6  ;;  %s4533_s10 = scalar_lea.vmem %s5283_s0, %s4372_s30  ;;  %v4415_v0 = vld [vmem:[%s5284_s1 + $0x38] sm:$0xff]  }
  0x11   : > { %3866 = vmatprep.subr.bf16.mxu0 %v4388_v7  ;;  %v256_v12 = vld [vmem:[%s4533_s10 + $0x1] sm:$0xff]  ;;  %v257_v13 = vld [vmem:[%s4533_s10 + $0x9] sm:$0xff]  ;;  %v3168_v14 = vld [vmem:[%s4533_s10 + $0x19] sm:$0xff] }
  0x12   : > { %v288_v15 = vpack.c.bf16 %v257_v13, %v256_v12  ;;  %v3169_v16 = vld [vmem:[%s4533_s10 + $0x21] sm:$0xff]  ;;  %v3170_v23 = vld [vmem:[%s4533_s10 + $0x31] sm:$0xff]  ;;  %v3171_v24 = vld [vmem:[%s4533_s10 + $0x39] sm:$0xff] }
  0x13   : > { %3675 = vmatpush3.bf16.msra.mxu1 %v4387_v6  ;;  %v1384_v17 = vpack.c.bf16 %v3169_v16, %v3168_v14  ;;  %v3172_v26 = vld [vmem:[%s4533_s10 + $0x49] sm:$0xff]  ;;  %v3173_v27 = vld [vmem:[%s4533_s10 + $0x51] sm:$0xff]  ;;  %v1385_v28 = vpack.c.bf16 %v3171_v24, %v3170_v23  ;;  %v3174_v32 = vld [vmem:[%s4533_s10 + $0x61] sm:$0xff] }
  0x14   : > { %3867 = vmatpush3.bf16.msra.mxu0 %v4388_v7  ;;  %3676 = vmatprep.subr.bf16.mxu1 %v4389_v8  ;;  %v1386_v30 = vpack.c.bf16 %v3173_v27, %v3172_v26  ;;  %v3175_v33 = vld [vmem:[%s4533_s10 + $0x69] sm:$0xff]  ;;  %v3176_v35 = vld [vmem:[%s4533_s10 + $0x79] sm:$0xff]  ;;  %v3177_v37 = vld [vmem:[%s4533_s10 + $0x81] sm:$0xff] }
  0x15   : > { %3868 = vmatprep.subr.bf16.mxu0 %v4390_v9  ;;  %3684 = vmatprep.mubr.bf16.mxu1 %v288_v15  ;;  %v1387_v38 = vpack.c.bf16 %v3175_v33, %v3174_v32  ;;  %v1388_v39 = vpack.c.bf16 %v3177_v37, %v3176_v35  ;;  %v3178_v42 = vld [vmem:[%s4533_s10 + $0x91] sm:$0xff]  ;;  %v3179_v43 = vld [vmem:[%s4533_s10 + $0x99] sm:$0xff]  ;;  %v3180_v45 = vld [vmem:[%s4533_s10 + $0xa9] sm:$0xff] }
  0x16   : > { %3876 = vmatprep.mubr.bf16.mxu0 %v1384_v17  ;;  %v3181_v46 = vld [vmem:[%s4533_s10 + $0xb1] sm:$0xff]  ;;  %v1389_v48 = vpack.c.bf16 %v3179_v43, %v3178_v42  ;;  %v3182_v52 = vld [vmem:[%s4533_s10 + $0xc1] sm:$0xff]  ;;  %v3183_v53 = vld [vmem:[%s4533_s10 + $0xc9] sm:$0xff] }
  0x17   : > { %3677 = vmatpush3.bf16.msra.mxu1 %v4389_v8  ;;  %v4599_v49 = vpack.c.bf16 %v3181_v46, %v3180_v45  ;;  %v3224_v55 = vld [vmem:[%s4533_s10 + $0x1a] sm:$0xff]  ;;  %v3225_v56 = vld [vmem:[%s4533_s10 + $0x22] sm:$0xff]  ;;  %v1391_v58 = vpack.c.bf16 %v3183_v53, %v3182_v52  ;;  %v3226_v63 = vld [vmem:[%s4533_s10 + $0x32] sm:$0xff] }
  0x18   : > { %3869 = vmatpush3.bf16.msra.mxu0 %v4390_v9  ;;  %3678 = vmatprep.subr.bf16.mxu1 %v4391_v10  ;;  %v4618_v59 = vpack.c.bf16 %v3225_v56, %v3224_v55  ;;  %v274_v61 = vld [vmem:[%s4533_s10 + $0xd9] sm:$0xff]  ;;  %v275_v62 = vld [vmem:[%s4533_s10 + $0xe1] sm:$0xff]  ;;  %v276_v2 = vld [vmem:[%s4533_s10 + $0xf1] sm:$0xff] }
  0x19   : > { %3870 = vmatprep.subr.bf16.mxu0 %v4392_v11  ;;  %v3227_v1 = vld [vmem:[%s4533_s10 + $0x3a] sm:$0xff]  ;;  %v3228_v5 = vld [vmem:[%s4533_s10 + $0x4a] sm:$0xff]  ;;  %v3229_v6 = vld [vmem:[%s4533_s10 + $0x52] sm:$0xff]  ;;  %v4639_v7 = vpack.c.bf16 %v275_v62, %v274_v61 }
  0x1a   : > { %v277_v3 = vld [vmem:[%s4533_s10 + $0xf9] sm:$0xff]  ;;  %v4646_v9 = vpack.c.bf16 %v3227_v1, %v3226_v63  ;;  %v4412_v12 = vld [vmem:[%s5284_s1 + $0x188] sm:$0xff]   ;;  %v279_v14 = vld [vmem:[%s4533_s10 + $0x111] sm:$0xff] }
  0x1b   : > { %3679 = vmatpush3.bf16.msra.mxu1 %v4391_v10  ;;  %v4644_v8 = vld [vmem:[%s5284_s1 + $0x80] sm:$0xff]   ;;  %v4648_v10 = vpack.c.bf16 %v277_v3, %v276_v2  ;;  %v278_v13 = vld [vmem:[%s4533_s10 + $0x109] sm:$0xff]  ;;  %v4416_v27 = vld [vmem:[%s5284_s1 + $0x198] sm:$0xff]  }
  0x1c   : > { %3871 = vmatpush3.bf16.msra.mxu0 %v4392_v11  ;;  %3680 = vmatprep.subr.bf16.mxu1 %v4393_v18  ;;  %v4650_v11 = vpack.c.bf16 %v3229_v6, %v3228_v5  ;;  %v3230_v15 = vld [vmem:[%s4533_s10 + $0x62] sm:$0xff]  ;;  %v3231_v16 = vld [vmem:[%s4533_s10 + $0x6a] sm:$0xff]  ;;  %v282_v26 = vld [vmem:[%s4533_s10 + $0x139] sm:$0xff] }
  0x1d   : > { %3872 = vmatprep.subr.bf16.mxu0 %v4394_v19  ;;  %v4673_v23 = vpack.c.bf16 %v3231_v16, %v3230_v15  ;;  %v285_v32 = vld [vmem:[%s4533_s10 + $0x159] sm:$0xff]  ;;  %v3236_v33 = vld [vmem:[%s4533_s10 + $0xaa] sm:$0xff]  ;;  %v3238_v43 = vld [vmem:[%s4533_s10 + $0xc2] sm:$0xff] }
  0x1e   : > { %v4418_v35 = vld [vmem:[%s5284_s1 + $0x1a0] sm:$0xff]   ;;  %v4420_v42 = vld [vmem:[%s5284_s1 + $0x1a8] sm:$0xff]   ;;  %v194_v55 = vld [vmem:[%s4533_s10 + $0x18] sm:$0xff] }
  0x1f   : > { %3681 = vmatpush3.bf16.msra.mxu1 %v4393_v18  ;;  %v281_v18 = vld [vmem:[%s4533_s10 + $0x129] sm:$0xff]  ;;  %v192_v45 = vld [vmem:[%s4533_s10] sm:$0xff]  ;;  %v197_v62 = vld [vmem:[%s4533_s10 + $0x38] sm:$0xff] }
  0x20   : > { %3873 = vmatpush3.bf16.msra.mxu0 %v4394_v19  ;;  %3682 = vmatprep.subr.bf16.mxu1 %v4395_v20  ;;  %v3232_v19 = vld [vmem:[%s4533_s10 + $0x7a] sm:$0xff]  ;;  %v193_v46 = vld [vmem:[%s4533_s10 + $0x8] sm:$0xff]  ;;  %v196_v61 = vld [vmem:[%s4533_s10 + $0x30] sm:$0xff] }
  0x21   : > { %3874 = vmatprep.subr.bf16.mxu0 %v4396_v21  ;;  %v224_v53 = vpack.c.bf16 %v193_v46, %v192_v45  ;;  %v195_v56 = vld [vmem:[%s4533_s10 + $0x20] sm:$0xff]  ;;  %v3244_v63 = vld [vmem:[%s4533_s10 + $0x10a] sm:$0xff] }
  0x22   : > { %v4746_v1 = vld [vmem:[%s5284_s1 + $0x1c0] sm:$0xff]   ;;  %v4748_v2 = vpack.c.bf16 %v195_v56, %v194_v55  ;;  %v198_v6 = vld [vmem:[%s4533_s10 + $0x48] sm:$0xff] }
  0x23   : > { %3683 = vmatpush3.bf16.msra.mxu1 %v4395_v20  ;;  %v3233_v20 = vld [vmem:[%s4533_s10 + $0x82] sm:$0xff]  ;;  %v3247_v15 = vld [vmem:[%s4533_s10 + $0x12a] sm:$0xff] }
  0x24   : > { %3875 = vmatpush3.bf16.msra.mxu0 %v4396_v21  ;;  %3716 = vmatprep.subr.bf16.mxu1 %v4397_v22  ;;  %v4414_v21 = vld [vmem:[%s5284_s1 + $0x190] sm:$0xff]   ;;  %v200_v16 = vld [vmem:[%s4533_s10 + $0x60] sm:$0xff]  ;;  %v4427_v46 = vld [vmem:[%s5284_s1 + $0xa8] sm:$0xff]  }
  0x25   : > { %3908 = vmatprep.subr.bf16.mxu0 %v4398_v25  ;;  %v208_v55 = vld [vmem:[%s4533_s10 + $0xc0] sm:$0xff]  ;;  %v209_v56 = vld [vmem:[%s4533_s10 + $0xc8] sm:$0xff] }
  0x26   : > { %3685 = vmatmul.mubr.bf16.vlgmr.msra.gmra.mrb[0].mxu1 %v1384_v17  ;;  %v280_v17 = vld [vmem:[%s4533_s10 + $0x121] sm:$0xff] }
  0x27   : > { %3877 = vmatmul.mubr.bf16.vlgmr.msra.gmra.mrb[0].mxu0 %v1385_v28  ;;  %3717 = vmatpush3.bf16.msra.mxu1 %v4397_v22  ;;  %v4671_v22 = vpack.c.bf16 %v279_v14, %v278_v13  ;;  %v4675_v24 = vpack.c.bf16 %v281_v18, %v280_v17  ;;  %v4419_v13 = vld [vmem:[%s5284_s1 + $0x88] sm:$0xff]   ;;  %v3248_v18 = vld [vmem:[%s4533_s10 + $0x13a] sm:$0xff] }
  0x28   : > { %3909 = vmatpush3.bf16.msra.mxu0 %v4398_v25  ;;  %3688 = vmatprep.mubr.bf16.mxu1 %v1385_v28  ;;  %v4677_v25 = vpack.c.bf16 %v3233_v20, %v3232_v19  ;;  %v283_v28 = vld [vmem:[%s4533_s10 + $0x141] sm:$0xff]  ;;  %v4421_v19 = vld [vmem:[%s5284_s1 + $0x90] sm:$0xff]  }
  0x29   : > { %3910 = vmatprep.subr.bf16.mxu0 %v4399_v29  ;;  %3880 = vmatprep.mubr.bf16.mxu0 %v1386_v30  ;;  %v3246_v14 = vld [vmem:[%s4533_s10 + $0x122] sm:$0xff] }
  0x2a   : > { %3718 = vmatprep.subr.bf16.mxu1 %v4400_v31  ;;  %v201_v17 = vld [vmem:[%s4533_s10 + $0x68] sm:$0xff] }
  0x2b   : > { %3719 = vmatpush3.bf16.msra.mxu1 %v4400_v31  ;;  %v284_v31 = vld [vmem:[%s4533_s10 + $0x151] sm:$0xff]  ;;  %v3249_v20 = vld [vmem:[%s4533_s10 + $0x142] sm:$0xff] }
  0x2c   : > { %3911 = vmatpush3.bf16.msra.mxu0 %v4399_v29  ;;  %3720 = vmatprep.subr.bf16.mxu1 %v4403_v36  ;;  %v3234_v29 = vld [vmem:[%s4533_s10 + $0x92] sm:$0xff] }
  0x2d   : > { %3912 = vmatprep.subr.bf16.mxu0 %v4401_v34 }
  0x2e   : > { %3689 = vmatmul.mubr.bf16.gmra.mrb[4].mxu1 %v1386_v30  ;;  %v3235_v30 = vld [vmem:[%s4533_s10 + $0x9a] sm:$0xff] }
  0x2f   : > { %3881 = vmatmul.mubr.bf16.gmra.mrb[4].mxu0 %v1387_v38  ;;  %3692 = vmatprep.mubr.bf16.mxu1 %v1387_v38  ;;  %v4699_v37 = vpack.c.bf16 %v3235_v30, %v3234_v29  ;;  %v4701_v38 = vpack.c.bf16 %v285_v32, %v284_v31  ;;  %v203_v29 = vld [vmem:[%s4533_s10 + $0x80] sm:$0xff]  ;;  %v4423_v30 = vld [vmem:[%s5284_s1 + $0x98] sm:$0xff]  }
  0x30   : > { %3913 = vmatpush3.bf16.msra.mxu0 %v4401_v34  ;;  %3884 = vmatprep.mubr.bf16.mxu0 %v1388_v39  ;;  %v3237_v34 = vld [vmem:[%s4533_s10 + $0xb2] sm:$0xff]  ;;  %v3251_v32 = vld [vmem:[%s4533_s10 + $0x15a] sm:$0xff] }
  0x31   : > { %3914 = vmatprep.subr.bf16.mxu0 %v4402_v40  ;;  %3721 = vmatpush3.bf16.msra.mxu1 %v4403_v36  ;;  %v4697_v36 = vpack.c.bf16 %v283_v28, %v282_v26  ;;  %v4780_v26 = vpack.c.bf16 %v201_v17, %v200_v16  ;;  %v202_v28 = vld [vmem:[%s4533_s10 + $0x78] sm:$0xff]  ;;  %v4428_v16 = vld [vmem:[%s5284_s1 + $0x1c8] sm:$0xff]  }
  0x32   : > { %3722 = vmatprep.subr.bf16.mxu1 %v4406_v41  ;;  %v3250_v31 = vld [vmem:[%s4533_s10 + $0x152] sm:$0xff]  ;;  %v214_v17 = vld [vmem:[%s4533_s10 + $0x108] sm:$0xff] }
  0x34   : > { %3915 = vmatpush3.bf16.msra.mxu0 %v4402_v40  ;;  %v286_v40 = vld [vmem:[%s4533_s10 + $0x169] sm:$0xff] }
  0x35   : > { %3916 = vmatprep.subr.bf16.mxu0 %v4404_v44  ;;  %3723 = vmatpush3.bf16.msra.mxu1 %v4406_v41  ;;  %v287_v41 = vld [vmem:[%s4533_s10 + $0x171] sm:$0xff] }
  0x36   : > { %3693 = vmatmul.mubr.bf16.gmra.mrb[8].mxu1 %v1388_v39  ;;  %3724 = vmatprep.subr.bf16.mxu1 %v4409_v47  ;;  %v4703_v39 = vpack.c.bf16 %v3237_v34, %v3236_v33  ;;  %v204_v33 = vld [vmem:[%s4533_s10 + $0x90] sm:$0xff]  ;;  %v205_v34 = vld [vmem:[%s4533_s10 + $0x98] sm:$0xff] }
  0x37   : > { %3885 = vmatmul.mubr.bf16.gmra.mrb[8].mxu0 %v1389_v48  ;;  %3696 = vmatprep.mubr.bf16.mxu1 %v1389_v48  ;;  %v3241_v48 = vld [vmem:[%s4533_s10 + $0xe2] sm:$0xff] }
  0x38   : > { %3917 = vmatpush3.bf16.msra.mxu0 %v4404_v44  ;;  %3888 = vmatprep.mubr.bf16.mxu0 %v4599_v49  ;;  %v3239_v44 = vld [vmem:[%s4533_s10 + $0xca] sm:$0xff] }
  0x39   : > { %3918 = vmatprep.subr.bf16.mxu0 %v4405_v50  ;;  %3725 = vmatpush3.bf16.msra.mxu1 %v4409_v47  ;;  %v3240_v47 = vld [vmem:[%s4533_s10 + $0xda] sm:$0xff]  ;;  %v4725_v52 = vpack.c.bf16 %v3239_v44, %v3238_v43  ;;  %v4804_v43 = vpack.c.bf16 %v3251_v32, %v3250_v31  ;;  %v4806_v44 = vpack.c.bf16 %v205_v34, %v204_v33  ;;  %v220_v33 = vld [vmem:[%s4533_s10 + $0x150] sm:$0xff] }
  0x3a   : > { %3726 = vmatprep.subr.bf16.mxu1 %v4411_v51  ;;  %v218_v31 = vld [vmem:[%s4533_s10 + $0x138] sm:$0xff]  ;;  %v219_v32 = vld [vmem:[%s4533_s10 + $0x140] sm:$0xff] }
  0x3b   : > { %v221_v34 = vld [vmem:[%s4533_s10 + $0x158] sm:$0xff] }
  0x3c   : > { %3919 = vmatpush3.bf16.msra.mxu0 %v4405_v50  ;;  %v4422_v50 = vld [vmem:[%s5284_s1 + $0x1b0] sm:$0xff]  }
  0x3d   : > { %3920 = vmatprep.subr.bf16.mxu0 %v4407_v54  ;;  %3727 = vmatpush3.bf16.msra.mxu1 %v4411_v51  ;;  %v4723_v51 = vpack.c.bf16 %v287_v41, %v286_v40  ;;  %v3253_v40 = vld [vmem:[%s4533_s10 + $0x172] sm:$0xff]  ;;  %v4425_v41 = vld [vmem:[%s5284_s1 + $0xa0] sm:$0xff]  }
  0x3e   : > { %3697 = vmatmul.mubr.bf16.gmra.mrb[12].mxu1 %v4599_v49  ;;  %3728 = vmatprep.subr.bf16.mxu1 %v4413_v57 }
  0x3f   : > { %3889 = vmatmul.mubr.bf16.gmra.mrb[12].mxu0 %v1391_v58  ;;  %3700 = vmatprep.mubr.bf16.mxu1 %v1391_v58  ;;  %v3242_v58 = vld [vmem:[%s4533_s10 + $0xf2] sm:$0xff] }
  0x40   : > { %3921 = vmatpush3.bf16.msra.mxu0 %v4407_v54  ;;  %3924 = vmatprep.mubr.bf16.mxu0 %v4618_v59  ;;  %v4727_v54 = vpack.c.bf16 %v3241_v48, %v3240_v47  ;;  %v206_v47 = vld [vmem:[%s4533_s10 + $0xa8] sm:$0xff]  ;;  %v207_v48 = vld [vmem:[%s4533_s10 + $0xb0] sm:$0xff] }
  0x41   : > { %3922 = vmatprep.subr.bf16.mxu0 %v4408_v60  ;;  %3729 = vmatpush3.bf16.msra.mxu1 %v4413_v57  ;;  %v4424_v57 = vld [vmem:[%s5284_s1 + $0x1b8] sm:$0xff]  }
  0x42   : > { %3730 = vmatprep.subr.bf16.mxu1 %v4415_v0 }
  0x44   : > { %3923 = vmatpush3.bf16.msra.mxu0 %v4408_v60  ;;  %v3243_v60 = vld [vmem:[%s4533_s10 + $0xfa] sm:$0xff] }
  0x45   : > { %3956 = vmatprep.subr.bf16.mxu0 %v4410_v4  ;;  %3731 = vmatpush3.bf16.msra.mxu1 %v4415_v0  ;;  %v3245_v0 = vld [vmem:[%s4533_s10 + $0x112] sm:$0xff]  ;;  %v4750_v3 = vpack.c.bf16 %v3243_v60, %v3242_v58  ;;  %v4826_v58 = vpack.c.bf16 %v207_v48, %v206_v47  ;;  %v222_v47 = vld [vmem:[%s4533_s10 + $0x168] sm:$0xff] }
  0x46   : > { %3701 = vmatmul.mubr.bf16.gmra.mrb[16].mxu1 %v4639_v7  ;;  %3764 = vmatprep.subr.bf16.mxu1 %v4644_v8  ;;  %v4754_v5 = vpack.c.bf16 %v3245_v0, %v3244_v63  ;;  %v210_v63 = vld [vmem:[%s4533_s10 + $0xd8] sm:$0xff]  ;;  %v211_v0 = vld [vmem:[%s4533_s10 + $0xe0] sm:$0xff]  ;;  %v223_v48 = vld [vmem:[%s4533_s10 + $0x170] sm:$0xff] }
  0x47   : > { %3925 = vmatmul.mubr.bf16.vlgmr.msra.gmra.mrb[0].mxu0 %v4646_v9  ;;  %3704 = vmatprep.mubr.bf16.mxu1 %v4648_v10 }
  0x48   : > { %3957 = vmatpush3.bf16.msra.mxu0 %v4410_v4  ;;  %3928 = vmatprep.mubr.bf16.mxu0 %v4650_v11  ;;  %v4752_v4 = vpack.c.bf16 %v197_v62, %v196_v61  ;;  %v4828_v61 = vpack.c.bf16 %v209_v56, %v208_v55  ;;  %v4431_v62 = vld [vmem:[%s5284_s1 + $0xb8] sm:$0xff]   ;;  %v4438_v55 = vld [vmem:[%s5284_s1 + $0x1f0] sm:$0xff]   ;;  %v4901_v56 = vpack.c.bf16 %v223_v48, %v222_v47 }
  0x49   : > { %3958 = vmatprep.subr.bf16.mxu0 %v4412_v12  ;;  %v3344_v47 = vld [vmem:[%s4533_s10 + $0x91] sm:$0xff]  ;;  %v3345_v48 = vld [vmem:[%s4533_s10 + $0x99] sm:$0xff] }
  0x4c   : > { %3959 = vmatpush3.bf16.msra.mxu0 %v4412_v12  ;;  %v199_v12 = vld [vmem:[%s4533_s10 + $0x50] sm:$0xff] }
  0x4d   : > { %3960 = vmatprep.subr.bf16.mxu0 %v4414_v21 }
  0x4e   : > { %3705 = vmatmul.mubr.bf16.gmra.mrb[20].mxu1 %v4671_v22 }
  0x4f   : > { %3929 = vmatmul.mubr.bf16.gmra.mrb[4].mxu0 %v4673_v23  ;;  %3708 = vmatprep.mubr.bf16.mxu1 %v4675_v24 }
  0x50   : > { %3932 = vmatprep.mubr.bf16.mxu0 %v4677_v25  ;;  %3961 = vmatpush3.bf16.msra.mxu0 %v4414_v21  ;;  %v4776_v21 = vpack.c.bf16 %v199_v12, %v198_v6  ;;  %v212_v6 = vld [vmem:[%s4533_s10 + $0xf0] sm:$0xff]  ;;  %v213_v12 = vld [vmem:[%s4533_s10 + $0xf8] sm:$0xff] }
  0x51   : > { %3962 = vmatprep.subr.bf16.mxu0 %v4416_v27 }
  0x54   : > { %3963 = vmatpush3.bf16.msra.mxu0 %v4416_v27  ;;  %v4782_v27 = vpack.c.bf16 %v3249_v20, %v3248_v18  ;;  %v215_v18 = vld [vmem:[%s4533_s10 + $0x110] sm:$0xff]  ;;  %v217_v20 = vld [vmem:[%s4533_s10 + $0x128] sm:$0xff] }
  0x55   : > { %3964 = vmatprep.subr.bf16.mxu0 %v4418_v35 }
  0x56   : > { %3709 = vmatmul.mubr.bf16.gmra.mrb[24].mxu1 %v4697_v36 }
  0x57   : > { %3933 = vmatmul.mubr.bf16.gmra.mrb[8].mxu0 %v4699_v37  ;;  %3712 = vmatprep.mubr.bf16.mxu1 %v4701_v38 }
  0x58   : > { %3936 = vmatprep.mubr.bf16.mxu0 %v4703_v39  ;;  %3965 = vmatpush3.bf16.msra.mxu0 %v4418_v35  ;;  %v3252_v35 = vld [vmem:[%s4533_s10 + $0x16a] sm:$0xff] }
  0x59   : > { %3966 = vmatprep.subr.bf16.mxu0 %v4420_v42  ;;  %v4808_v45 = vpack.c.bf16 %v3253_v40, %v3252_v35  ;;  %v4434_v35 = vld [vmem:[%s5284_s1 + $0x1e0] sm:$0xff]   ;;  %v4883_v40 = vpack.c.bf16 %v219_v32, %v218_v31  ;;  %v3341_v32 = vld [vmem:[%s4533_s10 + $0x69] sm:$0xff] }
  0x5a   : > { %v3340_v31 = vld [vmem:[%s4533_s10 + $0x61] sm:$0xff] }
  0x5c   : > { %3967 = vmatpush3.bf16.msra.mxu0 %v4420_v42  ;;  %v4802_v42 = vpack.c.bf16 %v203_v29, %v202_v28  ;;  %v4430_v28 = vld [vmem:[%s5284_s1 + $0x1d0] sm:$0xff]   ;;  %v4865_v29 = vpack.c.bf16 %v215_v18, %v214_v17  ;;  %v3337_v18 = vld [vmem:[%s4533_s10 + $0x39] sm:$0xff] }
  0x5d   : > { %3968 = vmatprep.subr.bf16.mxu0 %v4422_v50  ;;  %v3336_v17 = vld [vmem:[%s4533_s10 + $0x31] sm:$0xff] }
  0x5e   : > { %3713 = vmatmul.mubr.bf16.gmra.mrb[28].mxu1 %v4723_v51 }
  0x5f   : > { %3937 = vmatmul.mubr.bf16.gmra.mrb[12].mxu0 %v4725_v52  ;;  %3732 = vmatprep.mubr.bf16.mxu1 %v224_v53  ;;  %v3255_v53 = vld [vmem:[%s4533_s10 + $0x18a] sm:$0xff] }
  0x60   : > { %3940 = vmatprep.mubr.bf16.mxu0 %v4727_v54  ;;  %3969 = vmatpush3.bf16.msra.mxu0 %v4422_v50  ;;  %v3254_v50 = vld [vmem:[%s4533_s10 + $0x182] sm:$0xff] }
  0x61   : > { %3970 = vmatprep.subr.bf16.mxu0 %v4424_v57  ;;  %v1705_v60 = vpack.c.bf16 %v3255_v53, %v3254_v50  ;;  %v739_v50 = vld [vmem:[%s4533_s10 + $0x2] sm:$0xff]  ;;  %v740_v53 = vld [vmem:[%s4533_s10 + $0xa] sm:$0xff] }
  0x64   : > { %3971 = vmatpush3.bf16.msra.mxu0 %v4424_v57  ;;  %v4429_v57 = vld [vmem:[%s5284_s1 + $0xb0] sm:$0xff]  }
  0x65   : > { %4004 = vmatprep.subr.bf16.mxu0 %v4746_v1 }
  0x66   : > { %3733 = vmatmul.mubr.bf16.vlgmr.msra.gmra.mrb[0].mxu1 %v4748_v2 }
  0x67   : > { %3941 = vmatmul.mubr.bf16.gmra.mrb[16].mxu0 %v4750_v3  ;;  %3765 = vmatpush3.bf16.msra.mxu1 %v4644_v8  ;;  %v4778_v8 = vpack.c.bf16 %v3247_v15, %v3246_v14  ;;  %v4845_v14 = vpack.c.bf16 %v211_v0, %v210_v63  ;;  %v4847_v15 = vpack.c.bf16 %v213_v12, %v212_v6  ;;  %v4435_v63 = vld [vmem:[%s5284_s1 + $0xc8] sm:$0xff]   ;;  %v4437_v0 = vld [vmem:[%s5284_s1 + $0xd0] sm:$0xff]   ;;  %v4441_v12 = vld [vmem:[%s5284_s1 + $0xe0] sm:$0xff]  }
  0x68   : > { %3736 = vmatprep.mubr.bf16.mxu1 %v4752_v4  ;;  %3944 = vmatprep.mubr.bf16.mxu0 %v4754_v5  ;;  %v3309_v6 = vld [vmem:[%s4533_s10 + $0x188] sm:$0xff] }
  0x69   : > { %3766 = vmatprep.subr.bf16.mxu1 %v4419_v13 }
  0x6b   : > { %3767 = vmatpush3.bf16.msra.mxu1 %v4419_v13  ;;  %v4843_v13 = vld [vmem:[%s5284_s1 + $0xc0] sm:$0xff]  }
  0x6c   : > { %3768 = vmatprep.subr.bf16.mxu1 %v4421_v19 }
  0x6e   : > { %3737 = vmatmul.mubr.bf16.gmra.mrb[4].mxu1 %v4776_v21 }
  0x6f   : > { %3945 = vmatmul.mubr.bf16.gmra.mrb[20].mxu0 %v4778_v8  ;;  %3740 = vmatprep.mubr.bf16.mxu1 %v4780_v26 }
  0x70   : > { %3948 = vmatprep.mubr.bf16.mxu0 %v4782_v27  ;;  %3769 = vmatpush3.bf16.msra.mxu1 %v4421_v19  ;;  %v216_v19 = vld [vmem:[%s4533_s10 + $0x120] sm:$0xff] }
  0x71   : > { %3770 = vmatprep.subr.bf16.mxu1 %v4423_v30 }
  0x74   : > { %3771 = vmatpush3.bf16.msra.mxu1 %v4423_v30  ;;  %v4867_v30 = vpack.c.bf16 %v217_v20, %v216_v19  ;;  %v2303_v20 = vpack.c.bf16 %v3337_v18, %v3336_v17  ;;  %v3404_v17 = vld [vmem:[%s4533_s10 + $0xc2] sm:$0xff]  ;;  %v3405_v18 = vld [vmem:[%s4533_s10 + $0xca] sm:$0xff] }
  0x75   : > { %3772 = vmatprep.subr.bf16.mxu1 %v4425_v41 }
  0x76   : > { %3741 = vmatmul.mubr.bf16.gmra.mrb[8].mxu1 %v4802_v42 }
  0x77   : > { %3949 = vmatmul.mubr.bf16.gmra.mrb[24].mxu0 %v4804_v43  ;;  %3744 = vmatprep.mubr.bf16.mxu1 %v4806_v44 }
  0x78   : > { %3952 = vmatprep.mubr.bf16.mxu0 %v4808_v45  ;;  %3773 = vmatpush3.bf16.msra.mxu1 %v4425_v41  ;;  %v4885_v41 = vpack.c.bf16 %v221_v34, %v220_v33  ;;  %v2305_v34 = vpack.c.bf16 %v3341_v32, %v3340_v31 }
  0x79   : > { %3774 = vmatprep.subr.bf16.mxu1 %v4427_v46 }
  0x7c   : > { %3775 = vmatpush3.bf16.msra.mxu1 %v4427_v46  ;;  %v4436_v46 = vld [vmem:[%s5284_s1 + $0x1e8] sm:$0xff]  }
  0x7d   : > { %3776 = vmatprep.subr.bf16.mxu1 %v4429_v57 }
  0x7e   : > { %3745 = vmatmul.mubr.bf16.gmra.mrb[12].mxu1 %v4826_v58 }
  0x7f   : > { %3953 = vmatmul.mubr.bf16.gmra.mrb[28].mxu0 %v1705_v60  ;;  %3748 = vmatprep.mubr.bf16.mxu1 %v4828_v61  ;;  %v4440_v60 = vld [vmem:[%s5284_s1 + $0x1f8] sm:$0xff]  }
  0x80   : > { %3972 = vmatprep.mubr.bf16.mxu0 %v4752_v4  ;;  %3777 = vmatpush3.bf16.msra.mxu1 %v4429_v57  ;;  %v771_v57 = vpack.c.bf16 %v740_v53, %v739_v50  ;;  %v4446_v50 = vld [vmem:[%s5284_s1 + $0x210] sm:$0xff]  }
  0x81   : > { %3778 = vmatprep.subr.bf16.mxu1 %v4431_v62 }
  0x84   : > { %3779 = vmatpush3.bf16.msra.mxu1 %v4431_v62  ;;  %v4442_v62 = vld [vmem:[%s5284_s1 + $0x200] sm:$0xff]  }
  0x85   : > { %3812 = vmatprep.subr.bf16.mxu1 %v4843_v13 }
  0x86   : > { %3749 = vmatmul.mubr.bf16.gmra.mrb[16].mxu1 %v4845_v14 }
  0x87   : > { %3973 = vmatmul.mubr.bf16.vlgmr.msra.gmra.mrb[0].mxu0 %v4776_v21  ;;  %3752 = vmatprep.mubr.bf16.mxu1 %v4847_v15 }
  0x88   : > { %4005 = vmatpush3.bf16.msra.mxu0 %v4746_v1  ;;  %3976 = vmatprep.mubr.bf16.mxu0 %v4780_v26  ;;  %v4432_v1 = vld [vmem:[%s5284_s1 + $0x1d8] sm:$0xff]  }
  0x89   : > { %4006 = vmatprep.subr.bf16.mxu0 %v4428_v16 }
  0x8c   : > { %4007 = vmatpush3.bf16.msra.mxu0 %v4428_v16  ;;  %v3311_v16 = vld [vmem:[%s4533_s10 + $0x1a0] sm:$0xff] }
  0x8d   : > { %4008 = vmatprep.subr.bf16.mxu0 %v4430_v28 }
  0x8e   : > { %3753 = vmatmul.mubr.bf16.gmra.mrb[20].mxu1 %v4865_v29 }
  0x8f   : > { %3977 = vmatmul.mubr.bf16.gmra.mrb[4].mxu0 %v4802_v42  ;;  %3756 = vmatprep.mubr.bf16.mxu1 %v4867_v30 }
  0x90   : > { %3980 = vmatprep.mubr.bf16.mxu0 %v4806_v44  ;;  %4009 = vmatpush3.bf16.msra.mxu0 %v4430_v28  ;;  %v3338_v28 = vld [vmem:[%s4533_s10 + $0x49] sm:$0xff] }
  0x91   : > { %4010 = vmatprep.subr.bf16.mxu0 %v4432_v1 }
  0x94   : > { %4011 = vmatpush3.bf16.msra.mxu0 %v4432_v1  ;;  %v3339_v1 = vld [vmem:[%s4533_s10 + $0x51] sm:$0xff] }
  0x95   : > { %4012 = vmatprep.subr.bf16.mxu0 %v4434_v35  ;;  %v2304_v33 = vpack.c.bf16 %v3339_v1, %v3338_v28  ;;  %v3408_v28 = vld [vmem:[%s4533_s10 + $0xf2] sm:$0xff]  ;;  %v3409_v1 = vld [vmem:[%s4533_s10 + $0xfa] sm:$0xff] }
  0x96   : > { %3757 = vmatmul.mubr.bf16.gmra.mrb[24].mxu1 %v4883_v40  ;;  %v2617_v32 = vpack.c.bf16 %v3409_v1, %v3408_v28 }
  0x97   : > { %3981 = vmatmul.mubr.bf16.gmra.mrb[8].mxu0 %v4826_v58  ;;  %3760 = vmatprep.mubr.bf16.mxu1 %v4885_v41 }
  0x98   : > { %3984 = vmatprep.mubr.bf16.mxu0 %v4828_v61  ;;  %4013 = vmatpush3.bf16.msra.mxu0 %v4434_v35  ;;  %v3342_v35 = vld [vmem:[%s4533_s10 + $0x79] sm:$0xff] }
  0x99   : > { %4014 = vmatprep.subr.bf16.mxu0 %v4436_v46 }
  0x9c   : > { %4015 = vmatpush3.bf16.msra.mxu0 %v4436_v46  ;;  %v3343_v46 = vld [vmem:[%s4533_s10 + $0x81] sm:$0xff] }
  0x9d   : > { %4016 = vmatprep.subr.bf16.mxu0 %v4438_v55  ;;  %v2306_v53 = vpack.c.bf16 %v3343_v46, %v3342_v35  ;;  %v3189_v35 = vld [vmem:[%s4533_s10 + $0x111] sm:$0xff]  ;;  %v3412_v46 = vld [vmem:[%s4533_s10 + $0x122] sm:$0xff] }
  0x9e   : > { %3761 = vmatmul.mubr.bf16.gmra.mrb[28].mxu1 %v4901_v56 }
  0x9f   : > { %3985 = vmatmul.mubr.bf16.gmra.mrb[12].mxu0 %v4845_v14  ;;  %3780 = vmatprep.mubr.bf16.mxu1 %v771_v57  ;;  %v3349_v57 = vld [vmem:[%s4533_s10 + $0xc9] sm:$0xff] }
  0xa0   : > { %3988 = vmatprep.mubr.bf16.mxu0 %v4847_v15  ;;  %4017 = vmatpush3.bf16.msra.mxu0 %v4438_v55  ;;  %v2307_v55 = vpack.c.bf16 %v3345_v48, %v3344_v47  ;;  %v3413_v47 = vld [vmem:[%s4533_s10 + $0x12a] sm:$0xff] }
  0xa1   : > { %4018 = vmatprep.subr.bf16.mxu0 %v4440_v60 }
  0xa4   : > { %4019 = vmatpush3.bf16.msra.mxu0 %v4440_v60  ;;  %v4449_v60 = vld [vmem:[%s5284_s1 + $0x220] sm:$0xff]  }
  0xa5   : > { %4052 = vmatprep.subr.bf16.mxu0 %v4442_v62 }
  0xa6   : > { %3781 = vmatmul.mubr.bf16.vlgmr.msra.gmra.mrb[0].mxu1 %v4618_v59  ;;  %v4439_v59 = vld [vmem:[%s5284_s1 + $0xd8] sm:$0xff]  }
  0xa7   : > { %3989 = vmatmul.mubr.bf16.gmra.mrb[16].mxu0 %v4865_v29  ;;  %3813 = vmatpush3.bf16.msra.mxu1 %v4843_v13 }
  0xa8   : > { %3784 = vmatprep.mubr.bf16.mxu1 %v4646_v9  ;;  %3992 = vmatprep.mubr.bf16.mxu0 %v4867_v30  ;;  %v3308_v9 = vld [vmem:[%s4533_s10 + $0x180] sm:$0xff] }
  0xa9   : > { %3814 = vmatprep.subr.bf16.mxu1 %v4435_v63  ;;  %v4935_v13 = vpack.c.bf16 %v3309_v6, %v3308_v9  ;;  %v3399_v6 = vld [vmem:[%s4533_s10 + $0x82] sm:$0xff] }
  0xab   : > { %3815 = vmatpush3.bf16.msra.mxu1 %v4435_v63  ;;  %v4450_v63 = vld [vmem:[%s5284_s1 + $0x228] sm:$0xff]  }
  0xac   : > { %3816 = vmatprep.subr.bf16.mxu1 %v4437_v0 }
  0xae   : > { %3785 = vmatmul.mubr.bf16.gmra.mrb[4].mxu1 %v4650_v11  ;;  %v4443_v11 = vld [vmem:[%s5284_s1 + $0xe8] sm:$0xff]  }
  0xaf   : > { %3993 = vmatmul.mubr.bf16.gmra.mrb[20].mxu0 %v4883_v40  ;;  %3788 = vmatprep.mubr.bf16.mxu1 %v4673_v23  ;;  %v3310_v23 = vld [vmem:[%s4533_s10 + $0x198] sm:$0xff] }
  0xb0   : > { %3996 = vmatprep.mubr.bf16.mxu0 %v4885_v41  ;;  %3817 = vmatpush3.bf16.msra.mxu1 %v4437_v0  ;;  %v2012_v19 = vpack.c.bf16 %v3311_v16, %v3310_v23  ;;  %v3397_v0 = vld [vmem:[%s4533_s10 + $0x6a] sm:$0xff] }
  0xb1   : > { %3818 = vmatprep.subr.bf16.mxu1 %v4439_v59 }
  0xb4   : > { %3819 = vmatpush3.bf16.msra.mxu1 %v4439_v59  ;;  %v4460_v59 = vld [vmem:[%s5284_s1 + $0x138] sm:$0xff]  }
  0xb5   : > { %3820 = vmatprep.subr.bf16.mxu1 %v4441_v12 }
  0xb6   : > { %3789 = vmatmul.mubr.bf16.gmra.mrb[8].mxu1 %v4677_v25  ;;  %v4445_v25 = vld [vmem:[%s5284_s1 + $0xf0] sm:$0xff]  }
  0xb7   : > { %3997 = vmatmul.mubr.bf16.gmra.mrb[24].mxu0 %v4901_v56  ;;  %3792 = vmatprep.mubr.bf16.mxu1 %v4699_v37  ;;  %v4447_v37 = vld [vmem:[%s5284_s1 + $0xf8] sm:$0xff]  }
  0xb8   : > { %4000 = vmatprep.mubr.bf16.mxu0 %v4935_v13  ;;  %3821 = vmatpush3.bf16.msra.mxu1 %v4441_v12  ;;  %v3400_v12 = vld [vmem:[%s4533_s10 + $0x92] sm:$0xff] }
  0xb9   : > { %3822 = vmatprep.subr.bf16.mxu1 %v4443_v11 }
  0xbc   : > { %3823 = vmatpush3.bf16.msra.mxu1 %v4443_v11  ;;  %v3401_v11 = vld [vmem:[%s4533_s10 + $0x9a] sm:$0xff] }
  0xbd   : > { %3824 = vmatprep.subr.bf16.mxu1 %v4445_v25  ;;  %v2613_v16 = vpack.c.bf16 %v3401_v11, %v3400_v12 }
  0xbe   : > { %3793 = vmatmul.mubr.bf16.gmra.mrb[12].mxu1 %v4703_v39  ;;  %v4444_v39 = vld [vmem:[%s5284_s1 + $0x208] sm:$0xff]  }
  0xbf   : > { %4001 = vmatmul.mubr.bf16.gmra.mrb[28].mxu0 %v2012_v19  ;;  %3796 = vmatprep.mubr.bf16.mxu1 %v4725_v52  ;;  %v4453_v52 = vld [vmem:[%s5284_s1 + $0x100] sm:$0xff]   ;;  %v2615_v19 = vpack.c.bf16 %v3405_v18, %v3404_v17 }
  0xc0   : > { %4020 = vmatprep.mubr.bf16.mxu0 %v2303_v20  ;;  %3825 = vmatpush3.bf16.msra.mxu1 %v4445_v25  ;;  %v3184_v20 = vld [vmem:[%s4533_s10 + $0xd9] sm:$0xff] }
  0xc1   : > { %3826 = vmatprep.subr.bf16.mxu1 %v4447_v37 }
  0xc4   : > { %3827 = vmatpush3.bf16.msra.mxu1 %v4447_v37  ;;  %v3185_v37 = vld [vmem:[%s4533_s10 + $0xe1] sm:$0xff] }
  0xc5   : > { %4100 = vmatprep.subr.bf16.mxu1 %v4453_v52 }
  0xc6   : > { %3797 = vmatmul.mubr.bf16.gmra.mrb[16].mxu1 %v4727_v54  ;;  %v4448_v54 = vld [vmem:[%s5284_s1 + $0x218] sm:$0xff]  }
  0xc7   : > { %4021 = vmatmul.mubr.bf16.vlgmr.msra.gmra.mrb[0].mxu0 %v2304_v33  ;;  %3800 = vmatprep.mubr.bf16.mxu1 %v4750_v3  ;;  %v3348_v3 = vld [vmem:[%s4533_s10 + $0xc1] sm:$0xff]  ;;  %v3187_v33 = vld [vmem:[%s4533_s10 + $0xf9] sm:$0xff] }
  0xc8   : > { %4053 = vmatpush3.bf16.msra.mxu0 %v4442_v62  ;;  %4024 = vmatprep.mubr.bf16.mxu0 %v2305_v34  ;;  %v2309_v62 = vpack.c.bf16 %v3349_v57, %v3348_v3  ;;  %v3410_v34 = vld [vmem:[%s4533_s10 + $0x10a] sm:$0xff]  ;;  %v3414_v3 = vld [vmem:[%s4533_s10 + $0x13a] sm:$0xff]  ;;  %v3415_v57 = vld [vmem:[%s4533_s10 + $0x142] sm:$0xff] }
  0xc9   : > { %4054 = vmatprep.subr.bf16.mxu0 %v4444_v39 }
  0xcc   : > { %4055 = vmatpush3.bf16.msra.mxu0 %v4444_v39  ;;  %v3411_v39 = vld [vmem:[%s4533_s10 + $0x112] sm:$0xff] }
  0xcd   : > { %4056 = vmatprep.subr.bf16.mxu0 %v4446_v50  ;;  %v2618_v48 = vpack.c.bf16 %v3411_v39, %v3410_v34 }
  0xce   : > { %3801 = vmatmul.mubr.bf16.gmra.mrb[20].mxu1 %v4754_v5  ;;  %v4451_v5 = vld [vmem:[%s5284_s1 + $0x230] sm:$0xff]  }
  0xcf   : > { %4025 = vmatmul.mubr.bf16.gmra.mrb[4].mxu0 %v2306_v53  ;;  %3804 = vmatprep.mubr.bf16.mxu1 %v4778_v8  ;;  %v4452_v8 = vld [vmem:[%s5284_s1 + $0x238] sm:$0xff]   ;;  %v2619_v53 = vpack.c.bf16 %v3413_v47, %v3412_v46 }
  0xd0   : > { %4028 = vmatprep.mubr.bf16.mxu0 %v2307_v55  ;;  %4057 = vmatpush3.bf16.msra.mxu0 %v4446_v50  ;;  %v3190_v55 = vld [vmem:[%s4533_s10 + $0x121] sm:$0xff] }
  0xd1   : > { %4058 = vmatprep.subr.bf16.mxu0 %v4448_v54 }
  0xd4   : > { %4059 = vmatpush3.bf16.msra.mxu0 %v4448_v54  ;;  %v3191_v54 = vld [vmem:[%s4533_s10 + $0x129] sm:$0xff] }
  0xd5   : > { %4060 = vmatprep.subr.bf16.mxu0 %v4449_v60 }
  0xd6   : > { %3805 = vmatmul.mubr.bf16.gmra.mrb[24].mxu1 %v4782_v27  ;;  %v4458_v27 = vld [vmem:[%s5284_s1 + $0x128] sm:$0xff]  }
  0xd7   : > { %4029 = vmatmul.mubr.bf16.gmra.mrb[8].mxu0 %v4599_v49  ;;  %3808 = vmatprep.mubr.bf16.mxu1 %v4804_v43  ;;  %v4454_v49 = vld [vmem:[%s5284_s1 + $0x108] sm:$0xff]   ;;  %v4459_v43 = vld [vmem:[%s5284_s1 + $0x130] sm:$0xff]  }
  0xd8   : > { %4032 = vmatprep.mubr.bf16.mxu0 %v2309_v62  ;;  %4061 = vmatpush3.bf16.msra.mxu0 %v4449_v60  ;;  %v3192_v60 = vld [vmem:[%s4533_s10 + $0x139] sm:$0xff]  ;;  %v3193_v62 = vld [vmem:[%s4533_s10 + $0x141] sm:$0xff] }
  0xd9   : > { %4062 = vmatprep.subr.bf16.mxu0 %v4450_v63 }
  0xdc   : > { %4063 = vmatpush3.bf16.msra.mxu0 %v4450_v63  ;;  %v3416_v63 = vld [vmem:[%s4533_s10 + $0x152] sm:$0xff] }
  0xdd   : > { %4064 = vmatprep.subr.bf16.mxu0 %v4451_v5 }
  0xde   : > { %3809 = vmatmul.mubr.bf16.gmra.mrb[28].mxu1 %v4808_v45  ;;  %v3395_v45 = vld [vmem:[%s4533_s10 + $0x52] sm:$0xff] }
  0xdf   : > { %4033 = vmatmul.mubr.bf16.gmra.mrb[12].mxu0 %v4639_v7  ;;  %3828 = vmatprep.mubr.bf16.mxu1 %v4748_v2  ;;  %v4455_v7 = vld [vmem:[%s5284_s1 + $0x110] sm:$0xff]  }
  0xe0   : > { %4036 = vmatprep.mubr.bf16.mxu0 %v4648_v10  ;;  %4065 = vmatpush3.bf16.msra.mxu0 %v4451_v5  ;;  %v3364_v10 = vld [vmem:[%s4533_s10 + $0x181] sm:$0xff] }
  0xe1   : > { %4066 = vmatprep.subr.bf16.mxu0 %v4452_v8  ;;  %v3417_v5 = vld [vmem:[%s4533_s10 + $0x15a] sm:$0xff] }
  0xe4   : > { %4067 = vmatpush3.bf16.msra.mxu0 %v4452_v8  ;;  %v1395_v8 = vpack.c.bf16 %v3191_v54, %v3190_v55 }
  0xe6   : > { %3829 = vmatmul.mubr.bf16.vlgmr.msra.gmra.mrb[0].mxu1 %v4752_v4  ;;  %v3367_v4 = vld [vmem:[%s4533_s10 + $0x1a1] sm:$0xff] }
  0xe7   : > { %4037 = vmatmul.mubr.bf16.gmra.mrb[16].mxu0 %v4671_v22  ;;  %4108 = vmatpush3.bf16.msra.mxu1 %v4453_v52  ;;  %v3365_v22 = vld [vmem:[%s4533_s10 + $0x189] sm:$0xff] }
  0xe8   : > { %3832 = vmatprep.mubr.bf16.mxu1 %v4776_v21  ;;  %4040 = vmatprep.mubr.bf16.mxu0 %v4675_v24  ;;  %v4456_v24 = vld [vmem:[%s5284_s1 + $0x118] sm:$0xff]   ;;  %v5020_v2 = vpack.c.bf16 %v3365_v22, %v3364_v10  ;;  %v3188_v52 = vld [vmem:[%s4533_s10 + $0x109] sm:$0xff]  ;;  %v2621_v10 = vpack.c.bf16 %v3417_v5, %v3416_v63 }
  0xe9   : > { %4101 = vmatprep.subr.bf16.mxu1 %v4454_v49  ;;  %v3392_v21 = vld [vmem:[%s4533_s10 + $0x32] sm:$0xff]  ;;  %v1394_v50 = vpack.c.bf16 %v3189_v35, %v3188_v52 }
  0xea   : > { %v3194_v22 = vld [vmem:[%s4533_s10 + $0x151] sm:$0xff] }
  0xeb   : > { %4109 = vmatpush3.bf16.msra.mxu1 %v4454_v49  ;;  %v2620_v49 = vpack.c.bf16 %v3415_v57, %v3414_v3 }
  0xec   : > { %4102 = vmatprep.subr.bf16.mxu1 %v4455_v7 }
  0xee   : > { %3833 = vmatmul.mubr.bf16.gmra.mrb[4].mxu1 %v4780_v26  ;;  %v3393_v26 = vld [vmem:[%s4533_s10 + $0x3a] sm:$0xff] }
  0xef   : > { %4041 = vmatmul.mubr.bf16.gmra.mrb[20].mxu0 %v4697_v36  ;;  %3836 = vmatprep.mubr.bf16.mxu1 %v4802_v42  ;;  %v4457_v36 = vld [vmem:[%s5284_s1 + $0x120] sm:$0xff]  }
  0xf0   : > { %4044 = vmatprep.mubr.bf16.mxu0 %v4701_v38  ;;  %4110 = vmatpush3.bf16.msra.mxu1 %v4455_v7  ;;  %v3366_v38 = vld [vmem:[%s4533_s10 + $0x199] sm:$0xff]  ;;  %v1396_v7 = vpack.c.bf16 %v3193_v62, %v3192_v60 }
  0xf1   : > { %4103 = vmatprep.subr.bf16.mxu1 %v4456_v24  ;;  %v2318_v42 = vpack.c.bf16 %v3367_v4, %v3366_v38  ;;  %v3419_v38 = vld [vmem:[%s4533_s10 + $0x172] sm:$0xff]  ;;  %v3196_v4 = vld [vmem:[%s4533_s10 + $0x169] sm:$0xff] }
  0xf4   : > { %4111 = vmatpush3.bf16.msra.mxu1 %v4456_v24  ;;  %v3195_v24 = vld [vmem:[%s4533_s10 + $0x159] sm:$0xff] }
  0xf5   : > { %4104 = vmatprep.subr.bf16.mxu1 %v4457_v36 }
  0xf6   : > { %3837 = vmatmul.mubr.bf16.gmra.mrb[8].mxu1 %v4806_v44  ;;  %v3394_v44 = vld [vmem:[%s4533_s10 + $0x4a] sm:$0xff] }
  0xf7   : > { %4045 = vmatmul.mubr.bf16.gmra.mrb[24].mxu0 %v4723_v51  ;;  %3840 = vmatprep.mubr.bf16.mxu1 %v4826_v58  ;;  %v2609_v51 = vpack.c.bf16 %v3393_v26, %v3392_v21  ;;  %v3396_v58 = vld [vmem:[%s4533_s10 + $0x62] sm:$0xff]  ;;  %v2610_v9 = vpack.c.bf16 %v3395_v45, %v3394_v44  ;;  %v3197_v21 = vld [vmem:[%s4533_s10 + $0x171] sm:$0xff]  ;;  %v3422_v45 = vld [vmem:[%s4533_s10 + $0x19a] sm:$0xff] }
  0xf8   : > { %4048 = vmatprep.mubr.bf16.mxu0 %v5020_v2  ;;  %4112 = vmatpush3.bf16.msra.mxu1 %v4457_v36  ;;  %v3418_v36 = vld [vmem:[%s4533_s10 + $0x16a] sm:$0xff]  ;;  %v3420_v26 = vld [vmem:[%s4533_s10 + $0x182] sm:$0xff] }
  0xf9   : > { %4105 = vmatprep.subr.bf16.mxu1 %v4458_v27 }
  0xfc   : > { %4113 = vmatpush3.bf16.msra.mxu1 %v4458_v27  ;;  %v3421_v27 = vld [vmem:[%s4533_s10 + $0x18a] sm:$0xff] }
  0xfd   : > { %4106 = vmatprep.subr.bf16.mxu1 %v4459_v43  ;;  %v2623_v44 = vpack.c.bf16 %v3421_v27, %v3420_v26 }
  0xfe   : > { %3841 = vmatmul.mubr.bf16.gmra.mrb[12].mxu1 %v4828_v61  ;;  %v2611_v61 = vpack.c.bf16 %v3397_v0, %v3396_v58  ;;  %v3423_v58 = vld [vmem:[%s4533_s10 + $0x1a2] sm:$0xff] }
  0xff   : > { %4049 = vmatmul.mubr.bf16.gmra.mrb[28].mxu0 %v2318_v42  ;;  %3844 = vmatprep.mubr.bf16.mxu1 %v4845_v14  ;;  %v3398_v14 = vld [vmem:[%s4533_s10 + $0x7a] sm:$0xff]  ;;  %v1397_v42 = vpack.c.bf16 %v3195_v24, %v3194_v22  ;;  %v2624_v0 = vpack.c.bf16 %v3423_v58, %v3422_v45 }
 0x100   : > { %4068 = vmatprep.mubr.bf16.mxu0 %v2609_v51  ;;  %4114 = vmatpush3.bf16.msra.mxu1 %v4459_v43  ;;  %v2612_v23 = vpack.c.bf16 %v3399_v6, %v3398_v14  ;;  %v2622_v51 = vpack.c.bf16 %v3419_v38, %v3418_v36  ;;  %v1398_v43 = vpack.c.bf16 %v3197_v21, %v3196_v4 }
 0x101   : > { %4107 = vmatprep.subr.bf16.mxu1 %v4460_v59 }
 0x104   : > { %4115 = vmatpush3.bf16.msra.mxu1 %v4460_v59 }
 0x106   : > { %3845 = vmatmul.mubr.bf16.gmra.mrb[16].mxu1 %v4847_v15  ;;  %v3402_v15 = vld [vmem:[%s4533_s10 + $0xaa] sm:$0xff] }
 0x107   : > { %4069 = vmatmul.mubr.bf16.vlgmr.msra.gmra.mrb[0].mxu0 %v2610_v9  ;;  %3848 = vmatprep.mubr.bf16.mxu1 %v4865_v29  ;;  %v3403_v29 = vld [vmem:[%s4533_s10 + $0xb2] sm:$0xff] }
 0x108   : > { %4072 = vmatprep.mubr.bf16.mxu0 %v2611_v61  ;;  %v2614_v25 = vpack.c.bf16 %v3403_v29, %v3402_v15 }
 0x10e   : > { %3849 = vmatmul.mubr.bf16.gmra.mrb[20].mxu1 %v4867_v30  ;;  %v3406_v30 = vld [vmem:[%s4533_s10 + $0xda] sm:$0xff] }
 0x10f   : > { %4073 = vmatmul.mubr.bf16.gmra.mrb[4].mxu0 %v2612_v23  ;;  %3852 = vmatprep.mubr.bf16.mxu1 %v4883_v40  ;;  %v3407_v40 = vld [vmem:[%s4533_s10 + $0xe2] sm:$0xff] }
 0x110   : > { %4076 = vmatprep.mubr.bf16.mxu0 %v2613_v16  ;;  %v2616_v31 = vpack.c.bf16 %v3407_v40, %v3406_v30 }
 0x116   : > { %3853 = vmatmul.mubr.bf16.gmra.mrb[24].mxu1 %v4885_v41  ;;  %v1392_v41 = vpack.c.bf16 %v3185_v37, %v3184_v20 }
 0x117   : > { %4077 = vmatmul.mubr.bf16.gmra.mrb[8].mxu0 %v2614_v25  ;;  %3856 = vmatprep.mubr.bf16.mxu1 %v4901_v56  ;;  %v3186_v56 = vld [vmem:[%s4533_s10 + $0xf1] sm:$0xff]  ;;  %s3450_s10 = sshll.u32 %s5288_s13, 8 }
 0x118   : > { %4080 = vmatprep.mubr.bf16.mxu0 %v2615_v19  ;;  %s5126_s8 = scalar_lea.vmem %s5285_s2, %s3450_s10  ;;  %s5202_s14 = scalar_lea.vmem %s5286_s3, %s3450_s10 }
 0x119   : > { %v2885_v30 = vld [vmem:[%s5126_s8 + $0x10] sm:$0xff]  ;;  %v2883_v40 = vld [vmem:[%s5126_s8] sm:$0xff]  ;;  %v2886_v37 = vld [vmem:[%s5126_s8 + $0x18] sm:$0xff] }
 0x11a   : > { %v2884_v28 = vld [vmem:[%s5126_s8 + $0x8] sm:$0xff]  ;;  %v2889_v1 = vld [vmem:[%s5126_s8 + $0x30] sm:$0xff]  ;;  %v5141_v34 = vld [vmem:[%s5126_s8 + $0x58] sm:$0xff] }
 0x11b   : > { %v5144_v39 = vld [vmem:[%s5126_s8 + $0x48] sm:$0xff]  ;;  %v5147_v52 = vld [vmem:[%s5126_s8 + $0x70] sm:$0xff]  ;;  %v5150_v35 = vld [vmem:[%s5126_s8 + $0x60] sm:$0xff] }
 0x11c   : > { %v5153_v46 = vld [vmem:[%s5126_s8 + $0x78] sm:$0xff]  ;;  %v5156_v47 = vld [vmem:[%s5126_s8 + $0x68] sm:$0xff]  ;;  %v5171_v55 = vld [vmem:[%s5126_s8 + $0xb0] sm:$0xff] }
 0x11d   : > { %v5174_v54 = vld [vmem:[%s5126_s8 + $0xa0] sm:$0xff]  ;;  %v5177_v3 = vld [vmem:[%s5126_s8 + $0xb8] sm:$0xff]  ;;  %v5180_v57 = vld [vmem:[%s5126_s8 + $0xa8] sm:$0xff] }
 0x11e   : > { %3857 = vmatmul.mubr.bf16.gmra.mrb[28].mxu1 %v4935_v13  ;;  %v1393_v13 = vpack.c.bf16 %v3187_v33, %v3186_v56  ;;  %v2893_v56 = vld [vmem:[%s5126_s8 + $0x50] sm:$0xff]  ;;  %v5138_v33 = vld [vmem:[%s5126_s8 + $0x40] sm:$0xff]  ;;  %v5208_v36 = vld [vmem:[%s5126_s8 + $0xf8] sm:$0xff] }
 0x11f   : > { %4081 = vmatmul.mubr.bf16.gmra.mrb[12].mxu0 %v2616_v31  ;;  %3892 = vmatprep.mubr.bf16.mxu1 %v1392_v41  ;;  %v2887_v31 = vld [vmem:[%s5126_s8 + $0x20] sm:$0xff]  ;;  %v2890_v41 = vld [vmem:[%s5126_s8 + $0x38] sm:$0xff]  ;;  %v5183_v60 = vld [vmem:[%s5126_s8 + $0xd0] sm:$0xff] }
 0x120   : > { %4084 = vmatprep.mubr.bf16.mxu0 %v2617_v32  ;;  %v2888_v32 = vld [vmem:[%s5126_s8 + $0x28] sm:$0xff]  ;;  %v5186_v62 = vld [vmem:[%s5126_s8 + $0xc0] sm:$0xff] }
 0x121   : > { %v5205_v24 = vld [vmem:[%s5126_s8 + $0xe0] sm:$0xff]  ;;  %v5211_v38 = vld [vmem:[%s5126_s8 + $0xe8] sm:$0xff] }
 0x126   : > { %3893 = vmatmul.mubr.bf16.vlgmr.msra.gmra.mrb[16].mxu1 %v1393_v13  ;;  %v5159_v13 = vld [vmem:[%s5126_s8 + $0x90] sm:$0xff] }
 0x127   : > { %4085 = vmatmul.mubr.bf16.gmra.mrb[16].mxu0 %v2618_v48  ;;  %3896 = vmatprep.mubr.bf16.mxu1 %v1394_v50  ;;  %v5162_v48 = vld [vmem:[%s5126_s8 + $0x80] sm:$0xff]  ;;  %v5165_v50 = vld [vmem:[%s5126_s8 + $0x98] sm:$0xff] }
 0x128   : > { %4088 = vmatprep.mubr.bf16.mxu0 %v2619_v53  ;;  %v5168_v53 = vld [vmem:[%s5126_s8 + $0x88] sm:$0xff] }
 0x12e   : > { %3897 = vmatmul.mubr.bf16.gmra.mrb[20].mxu1 %v1395_v8  ;;  %v5189_v8 = vld [vmem:[%s5126_s8 + $0xd8] sm:$0xff] }
 0x12f   : > { %4089 = vmatmul.mubr.bf16.gmra.mrb[20].mxu0 %v2620_v49  ;;  %3900 = vmatprep.mubr.bf16.mxu1 %v1396_v7  ;;  %v5192_v49 = vld [vmem:[%s5126_s8 + $0xc8] sm:$0xff]  ;;  %v5195_v7 = vld [vmem:[%s5126_s8 + $0xf0] sm:$0xff] }
 0x130   : > { %4092 = vmatprep.mubr.bf16.mxu0 %v2621_v10 }
 0x136   : > { %3901 = vmatmul.mubr.bf16.gmra.mrb[24].mxu1 %v1397_v42 }
 0x137   : > { %4093 = vmatmul.mubr.bf16.gmra.mrb[24].mxu0 %v2622_v51  ;;  %3904 = vmatprep.mubr.bf16.mxu1 %v1398_v43 }
 0x138   : > { %4096 = vmatprep.mubr.bf16.mxu0 %v2623_v44 }
 0x13e   : > { %3905 = vmatmul.mubr.bf16.gmra.mrb[28].mxu1 %v5020_v2 }
 0x13f   : > { %4097 = vmatmul.mubr.bf16.gmra.mrb[28].mxu0 %v2624_v0 }
 0x1b9   : > { %v3830_v59 = vpop.f32.mrb[0].mxu1 }
 0x1ba   : > { %v1193_v9 = vpop.f32.mrb[1].mxu1 }
 0x1bb   : > { %v3831_v61 = vpop.f32.mrb[2].mxu1 }
 0x1bc   : > { %v1196_v14 = vpop.f32.mrb[3].mxu1 }
 0x1c1   : > { %v5096_v6 = vpop.f32.mrb[4].mxu1 }
 0x1c2   : > { %v5098_v12 = vpop.f32.mrb[5].mxu1 }
 0x1c3   : > { %v5100_v11 = vpop.f32.mrb[6].mxu1 }
 0x1c4   : > { %v5102_v23 = vpop.f32.mrb[7].mxu1 }
 0x1c9   : > { %v5104_v16 = vpop.f32.mrb[8].mxu1 }
 0x1ca   : > { %v5106_v15 = vpop.f32.mrb[9].mxu1 }
 0x1cb   : > { %v5108_v2 = vpop.f32.mrb[10].mxu1 }
 0x1cc   : > { %v5110_v29 = vpop.f32.mrb[11].mxu1 }
 0x1d1   : > { %v5112_v17 = vpop.f32.mrb[12].mxu1 }
 0x1d2   : > { %v5114_v18 = vpop.f32.mrb[13].mxu1 }
 0x1d3   : > { %v5116_v25 = vpop.f32.mrb[14].mxu1 }
 0x1d4   : > { %v5119_v19 = vpop.f32.mrb[15].mxu1 }
 0x1da   : > { %v4070_v20 = vpop.f32.mrb[0].mxu0 }
 0x1db   : > { %v4116_v63 = vadd.f32 %v4070_v20, %v3830_v59  ;;  %v2724_v5 = vpop.f32.mrb[1].mxu0 }
 0x1dc   : > { %v4117_v10 = vadd.f32 %v2724_v5, %v1193_v9  ;;  %v4071_v22 = vpop.f32.mrb[2].mxu0 }
 0x1dd   : > { %v2917_v4 = vadd.f32 %v4116_v63, %v2885_v30  ;;  %v4118_v21 = vadd.f32 %v4071_v22, %v3831_v61  ;;  %v2727_v26 = vpop.f32.mrb[3].mxu0 }
 0x1de   : > { %v2915_v27 = vadd.f32 %v4117_v10, %v2883_v40  ;;  %v4119_v42 = vadd.f32 %v2727_v26, %v1196_v14 }
 0x1df   : > { %v2918_v51 = vadd.f32 %v4118_v21, %v2886_v37  ;;  %2949 = vst [vmem:[%s5202_s14 + $0x10] sm:$0xff] %v2917_v4 }
 0x1e0   : > { %v2916_v43 = vadd.f32 %v4119_v42, %v2884_v28  ;;  %2947 = vst [vmem:[%s5202_s14] sm:$0xff] %v2915_v27 }
 0x1e1   : > { %2950 = vst [vmem:[%s5202_s14 + $0x18] sm:$0xff] %v2918_v51 }
 0x1e2   : > { %v4074_v44 = vpop.f32.mrb[4].mxu0  ;;  %2948 = vst [vmem:[%s5202_s14 + $0x8] sm:$0xff] %v2916_v43 }
 0x1e3   : > { %v4120_v45 = vadd.f32 %v4074_v44, %v5096_v6  ;;  %v2740_v58 = vpop.f32.mrb[5].mxu0 }
 0x1e4   : > { %v4121_v0 = vadd.f32 %v2740_v58, %v5098_v12  ;;  %v4075_v59 = vpop.f32.mrb[6].mxu0 }
 0x1e5   : > { %v2921_v9 = vadd.f32 %v4120_v45, %v2889_v1  ;;  %v4122_v61 = vadd.f32 %v4075_v59, %v5100_v11  ;;  %v2743_v14 = vpop.f32.mrb[7].mxu0 }
 0x1e6   : > { %v2919_v30 = vadd.f32 %v4121_v0, %v2887_v31  ;;  %v4123_v40 = vadd.f32 %v2743_v14, %v5102_v23 }
 0x1e7   : > { %v2922_v20 = vadd.f32 %v4122_v61, %v2890_v41  ;;  %2953 = vst [vmem:[%s5202_s14 + $0x30] sm:$0xff] %v2921_v9 }
 0x1e8   : > { %v2920_v37 = vadd.f32 %v4123_v40, %v2888_v32  ;;  %2951 = vst [vmem:[%s5202_s14 + $0x20] sm:$0xff] %v2919_v30 }
 0x1e9   : > { %2954 = vst [vmem:[%s5202_s14 + $0x38] sm:$0xff] %v2922_v20 }
 0x1ea   : > { %v4078_v6 = vpop.f32.mrb[8].mxu0  ;;  %2952 = vst [vmem:[%s5202_s14 + $0x28] sm:$0xff] %v2920_v37 }
 0x1eb   : > { %v4124_v12 = vadd.f32 %v4078_v6, %v5104_v16  ;;  %v2756_v28 = vpop.f32.mrb[9].mxu0 }
 0x1ec   : > { %v4125_v11 = vadd.f32 %v2756_v28, %v5106_v15  ;;  %v4079_v1 = vpop.f32.mrb[10].mxu0 }
 0x1ed   : > { %v2925_v31 = vadd.f32 %v4124_v12, %v2893_v56  ;;  %v4126_v23 = vadd.f32 %v4079_v1, %v5108_v2  ;;  %v2759_v41 = vpop.f32.mrb[11].mxu0 }
 0x1ee   : > { %v2923_v63 = vadd.f32 %v4125_v11, %v5138_v33  ;;  %v4127_v32 = vadd.f32 %v2759_v41, %v5110_v29 }
 0x1ef   : > { %v2926_v5 = vadd.f32 %v4126_v23, %v5141_v34  ;;  %2957 = vst [vmem:[%s5202_s14 + $0x50] sm:$0xff] %v2925_v31 }
 0x1f0   : > { %v2924_v10 = vadd.f32 %v4127_v32, %v5144_v39  ;;  %2955 = vst [vmem:[%s5202_s14 + $0x40] sm:$0xff] %v2923_v63 }
 0x1f1   : > { %2958 = vst [vmem:[%s5202_s14 + $0x58] sm:$0xff] %v2926_v5 }
 0x1f2   : > { %v4082_v16 = vpop.f32.mrb[12].mxu0  ;;  %2956 = vst [vmem:[%s5202_s14 + $0x48] sm:$0xff] %v2924_v10 }
 0x1f3   : > { %v4128_v15 = vadd.f32 %v4082_v16, %v5112_v17  ;;  %v2772_v2 = vpop.f32.mrb[13].mxu0 }
 0x1f4   : > { %v4129_v56 = vadd.f32 %v2772_v2, %v5114_v18  ;;  %v4083_v33 = vpop.f32.mrb[14].mxu0 }
 0x1f5   : > { %v2929_v29 = vadd.f32 %v4128_v15, %v5147_v52  ;;  %v4130_v34 = vadd.f32 %v4083_v33, %v5116_v25  ;;  %v2775_v22 = vpop.f32.mrb[15].mxu0 }
 0x1f6   : > { %v2927_v39 = vadd.f32 %v4129_v56, %v5150_v35  ;;  %v4131_v4 = vadd.f32 %v2775_v22, %v5119_v19 }
 0x1f7   : > { %v2930_v21 = vadd.f32 %v4130_v34, %v5153_v46  ;;  %2961 = vst [vmem:[%s5202_s14 + $0x70] sm:$0xff] %v2929_v29 }
 0x1f8   : > { %v2928_v26 = vadd.f32 %v4131_v4, %v5156_v47  ;;  %2959 = vst [vmem:[%s5202_s14 + $0x60] sm:$0xff] %v2927_v39 }
 0x1f9   : > { %v3894_v17 = vpop.f32.mrb[16].mxu1  ;;  %2962 = vst [vmem:[%s5202_s14 + $0x78] sm:$0xff] %v2930_v21 }
 0x1fa   : > { %v4086_v18 = vpop.f32.mrb[16].mxu0  ;;  %v1563_v27 = vpop.f32.mrb[17].mxu1  ;;  %2960 = vst [vmem:[%s5202_s14 + $0x68] sm:$0xff] %v2928_v26 }
 0x1fb   : > { %v4132_v52 = vadd.f32 %v4086_v18, %v3894_v17  ;;  %v2788_v25 = vpop.f32.mrb[17].mxu0  ;;  %v3895_v42 = vpop.f32.mrb[18].mxu1 }
 0x1fc   : > { %v4133_v35 = vadd.f32 %v2788_v25, %v1563_v27  ;;  %v4087_v19 = vpop.f32.mrb[18].mxu0  ;;  %v1566_v51 = vpop.f32.mrb[19].mxu1 }
 0x1fd   : > { %v2933_v46 = vadd.f32 %v4132_v52, %v5159_v13  ;;  %v4134_v43 = vadd.f32 %v4087_v19, %v3895_v42  ;;  %v2791_v47 = vpop.f32.mrb[19].mxu0 }
 0x1fe   : > { %v2931_v44 = vadd.f32 %v4133_v35, %v5162_v48  ;;  %v4135_v45 = vadd.f32 %v2791_v47, %v1566_v51 }
 0x1ff   : > { %v2934_v58 = vadd.f32 %v4134_v43, %v5165_v50  ;;  %2965 = vst [vmem:[%s5202_s14 + $0x90] sm:$0xff] %v2933_v46 }
 0x200   : > { %v2932_v0 = vadd.f32 %v4135_v45, %v5168_v53  ;;  %2963 = vst [vmem:[%s5202_s14 + $0x80] sm:$0xff] %v2931_v44 }
 0x201   : > { %v3898_v59 = vpop.f32.mrb[20].mxu1  ;;  %2966 = vst [vmem:[%s5202_s14 + $0x98] sm:$0xff] %v2934_v58 }
 0x202   : > { %v4090_v9 = vpop.f32.mrb[20].mxu0  ;;  %v1579_v61 = vpop.f32.mrb[21].mxu1  ;;  %2964 = vst [vmem:[%s5202_s14 + $0x88] sm:$0xff] %v2932_v0 }
 0x203   : > { %v4136_v14 = vadd.f32 %v4090_v9, %v3898_v59  ;;  %v2804_v13 = vpop.f32.mrb[21].mxu0  ;;  %v3899_v30 = vpop.f32.mrb[22].mxu1 }
 0x204   : > { %v4137_v40 = vadd.f32 %v2804_v13, %v1579_v61  ;;  %v4091_v48 = vpop.f32.mrb[22].mxu0  ;;  %v1582_v20 = vpop.f32.mrb[23].mxu1 }
 0x205   : > { %v2937_v50 = vadd.f32 %v4136_v14, %v5171_v55  ;;  %v4138_v37 = vadd.f32 %v4091_v48, %v3899_v30  ;;  %v2807_v53 = vpop.f32.mrb[23].mxu0 }
 0x206   : > { %v2935_v6 = vadd.f32 %v4137_v40, %v5174_v54  ;;  %v4139_v12 = vadd.f32 %v2807_v53, %v1582_v20 }
 0x207   : > { %v2938_v28 = vadd.f32 %v4138_v37, %v5177_v3  ;;  %2969 = vst [vmem:[%s5202_s14 + $0xb0] sm:$0xff] %v2937_v50 }
 0x208   : > { %v2936_v11 = vadd.f32 %v4139_v12, %v5180_v57  ;;  %2967 = vst [vmem:[%s5202_s14 + $0xa0] sm:$0xff] %v2935_v6 }
 0x209   : > { %v3902_v1 = vpop.f32.mrb[24].mxu1  ;;  %2970 = vst [vmem:[%s5202_s14 + $0xb8] sm:$0xff] %v2938_v28 }
 0x20a   : > { %v4094_v31 = vpop.f32.mrb[24].mxu0  ;;  %v1595_v23 = vpop.f32.mrb[25].mxu1  ;;  %2968 = vst [vmem:[%s5202_s14 + $0xa8] sm:$0xff] %v2936_v11 }
 0x20b   : > { %v4140_v41 = vadd.f32 %v4094_v31, %v3902_v1  ;;  %v2820_v55 = vpop.f32.mrb[25].mxu0  ;;  %v3903_v63 = vpop.f32.mrb[26].mxu1 }
 0x20c   : > { %v4141_v32 = vadd.f32 %v2820_v55, %v1595_v23  ;;  %v4095_v54 = vpop.f32.mrb[26].mxu0  ;;  %v1598_v5 = vpop.f32.mrb[27].mxu1 }
 0x20d   : > { %v2941_v3 = vadd.f32 %v4140_v41, %v5183_v60  ;;  %v4142_v10 = vadd.f32 %v4095_v54, %v3903_v63  ;;  %v2823_v57 = vpop.f32.mrb[27].mxu0 }
 0x20e   : > { %v2939_v16 = vadd.f32 %v4141_v32, %v5186_v62  ;;  %v4143_v15 = vadd.f32 %v2823_v57, %v1598_v5 }
 0x20f   : > { %v2942_v2 = vadd.f32 %v4142_v10, %v5189_v8  ;;  %2973 = vst [vmem:[%s5202_s14 + $0xd0] sm:$0xff] %v2941_v3 }
 0x210   : > { %v2940_v56 = vadd.f32 %v4143_v15, %v5192_v49  ;;  %2971 = vst [vmem:[%s5202_s14 + $0xc0] sm:$0xff] %v2939_v16 }
 0x211   : > { %v3906_v33 = vpop.f32.mrb[28].mxu1  ;;  %2974 = vst [vmem:[%s5202_s14 + $0xd8] sm:$0xff] %v2942_v2 }
 0x212   : > { %v4098_v29 = vpop.f32.mrb[28].mxu0  ;;  %v1611_v34 = vpop.f32.mrb[29].mxu1  ;;  %2972 = vst [vmem:[%s5202_s14 + $0xc8] sm:$0xff] %v2940_v56 }
 0x213   : > { %v4144_v60 = vadd.f32 %v4098_v29, %v3906_v33  ;;  %v2836_v22 = vpop.f32.mrb[29].mxu0  ;;  %v3907_v39 = vpop.f32.mrb[30].mxu1 }
 0x214   : > { %v4145_v62 = vadd.f32 %v2836_v22, %v1611_v34  ;;  %v4099_v4 = vpop.f32.mrb[30].mxu0  ;;  %v1614_v21 = vpop.f32.mrb[31].mxu1 }
 0x215   : > { %v2945_v8 = vadd.f32 %v4144_v60, %v5195_v7  ;;  %v4146_v26 = vadd.f32 %v4099_v4, %v3907_v39  ;;  %v2839_v49 = vpop.f32.mrb[31].mxu0 }
 0x216   : > { %v2943_v17 = vadd.f32 %v4145_v62, %v5205_v24  ;;  %v4147_v18 = vadd.f32 %v2839_v49, %v1614_v21 }
 0x217   : > { %v2946_v27 = vadd.f32 %v4146_v26, %v5208_v36  ;;  %2977 = vst [vmem:[%s5202_s14 + $0xf0] sm:$0xff] %v2945_v8 }
 0x218   : > { %v2944_v52 = vadd.f32 %v4147_v18, %v5211_v38  ;;  %2975 = vst [vmem:[%s5202_s14 + $0xe0] sm:$0xff] %v2943_v17 }
 0x219   : > { %2978 = vst [vmem:[%s5202_s14 + $0xf8] sm:$0xff] %v2946_v27 }
 0x21a   : > { %2976 = vst [vmem:[%s5202_s14 + $0xe8] sm:$0xff] %v2944_v52 }
 0x21b PF: > { %s13_s12 = sadd.s32 1, %s4467_s12  }
 0x21c   : > { %p10_p4 = scmp.ge.s32.totalorder %s13_s12, 4  }
 0x21e   :  { %12 = sbr.rel (!%p10_p4) target bundleno = 1 (0x1), region = 75 }

</bundles_post_ra>
